<compile_context>
chip_gen: v7x
topology: tpu7x:2x2x1
jax: 0.10.0
libtpu: 0.0.40
codegen_flags: <defaults>
</compile_context>

<pallas_src>
import jax
import jax.numpy as jnp
from jax.experimental import pallas as pl
from jax.experimental.pallas import tpu as pltpu

_LEAKY_SLOPE = 0.2


def _leaky_relu(v):
    # max(v, 0.2*v): mul+max (2 VPU ops) instead of cmp+select+mul.
    return jnp.maximum(v, _LEAKY_SLOPE * v)


def decoder_kernel(x_ref, w1_ref, b1_ref, w2_ref, b2_ref, w3_ref, b3_ref, out_ref):
    """Fused 3-layer decoder MLP on one (TB, ...) batch tile."""
    x = x_ref[...].astype(jnp.bfloat16)

    # Layer 1: (TB, L) @ (L, Hp) + (1, Hp)
    h = jnp.dot(x, w1_ref[...], preferred_element_type=jnp.float32) + b1_ref[...]
    h = _leaky_relu(h)

    # Layer 2: (TB, Hp) @ (Hp, Hp) + (1, Hp)
    h = jnp.dot(h.astype(jnp.bfloat16), w2_ref[...],
                preferred_element_type=jnp.float32) + b2_ref[...]
    h = _leaky_relu(h)

    # Output layer: (TB, Hp) @ (Hp, O) + (1, O), then exact sigmoid.
    o = jnp.dot(h.astype(jnp.bfloat16), w3_ref[...],
                preferred_element_type=jnp.float32) + b3_ref[...]
    out_ref[...] = (1.0 / (1.0 + jnp.exp(-o))).astype(out_ref.dtype)


def _round_up(n, m):
    return ((n + m - 1) // m) * m


def _pad2d(a, rows, cols):
    return jnp.pad(a, ((0, rows - a.shape[0]), (0, cols - a.shape[1])))


def prepare_decoder_params(params):
    """One-time padding + bf16 cast of the weights (hoisted out of the forward).

    Hidden dim is zero-padded to a multiple of 128 (lane-dense, and exact:
    leaky_relu(0)=0 meets zero-padded weight rows). The output feature dim is
    left unpadded so the kernel can write the (B, O) result directly.
    """
    w1, b1 = params["w1"], params["b1"]
    w2, b2 = params["w2"], params["b2"]
    w3, b3 = params["w3"], params["b3"]

    L, H = w1.shape
    O = w3.shape[1]
    Hp = _round_up(H, 128)

    return {
        "w1": _pad2d(w1, L, Hp).astype(jnp.bfloat16),
        "b1": _pad2d(b1, 1, Hp),                        # biases stay f32 (added to f32 acc)
        "w2": _pad2d(w2, Hp, Hp).astype(jnp.bfloat16),
        "b2": _pad2d(b2, 1, Hp),
        "w3": _pad2d(w3, Hp, O).astype(jnp.bfloat16),   # rows padded to Hp, cols unpadded
        "b3": b3,
    }


def _choose_batch_tile(B, max_tile=1024, target_steps=2):
    """Largest multiple-of-8 tile <= max_tile; keep >= target_steps grid steps
    when B is large enough to split (feeds both v7x TensorCores)."""
    if B <= max_tile // target_steps:
        return max(B, 1)                    # single tile; splitting only adds overhead
    steps = max(target_steps, pl.cdiv(B, max_tile))
    return min(max_tile, _round_up(pl.cdiv(B, steps), 8))


def decoder_forward(x, prepared, *, max_batch_tile=1024, out_dtype=jnp.float32):
    """x: (B, latent_dim) float32. prepared: output of prepare_decoder_params."""
    w1p, b1p = prepared["w1"], prepared["b1"]
    w2p, b2p = prepared["w2"], prepared["b2"]
    w3p, b3p = prepared["w3"], prepared["b3"]

    B, L = x.shape
    Hp = w1p.shape[1]
    O = w3p.shape[1]

    TB = _choose_batch_tile(B, max_batch_tile)
    grid = (pl.cdiv(B, TB),)

    resident = lambda i: (0, 0)   # weights/biases: same block every grid step
    stream = lambda i: (i, 0)     # x / out: one batch tile per grid step

    def resident_spec(shape):
        # Pinned blocks never change -> single buffer (halves weight VMEM use).
        return pl.BlockSpec(shape, resident, pipeline_mode=pl.Buffered(1))

    out_itemsize = jnp.dtype(out_dtype).itemsize
    weight_bytes = sum(a.size * a.dtype.itemsize
                       for a in (w1p, b1p, w2p, b2p, w3p, b3p))
    stream_bytes = 2 * (TB * L * x.dtype.itemsize + TB * O * out_itemsize)  # double-buffered
    scratch_bytes = 3 * TB * Hp * 4                                          # f32 intermediates headroom
    vmem_limit = int(min(48 * 1024 * 1024,
                         max(8 * 1024 * 1024,
                             2 * (weight_bytes + stream_bytes + scratch_bytes))))

    cost = pl.CostEstimate(
        flops=2 * B * (L * Hp + Hp * Hp + Hp * O),
        transcendentals=B * O,
        bytes_accessed=(B * L * x.dtype.itemsize + B * O * out_itemsize + weight_bytes),
    )

    return pl.pallas_call(
        decoder_kernel,
        out_shape=jax.ShapeDtypeStruct((B, O), out_dtype),
        grid=grid,
        in_specs=[
            pl.BlockSpec((TB, L), stream),   # x (streamed)
            resident_spec((L, Hp)),          # w1
            resident_spec((1, Hp)),          # b1
            resident_spec((Hp, Hp)),         # w2
            resident_spec((1, Hp)),          # b2
            resident_spec((Hp, O)),          # w3
            resident_spec((1, O)),           # b3
        ],
        out_specs=pl.BlockSpec((TB, O), stream),
        compiler_params=pltpu.CompilerParams(
            dimension_semantics=("parallel",),
            vmem_limit_bytes=vmem_limit,
        ),
        cost_estimate=cost,
    )(x, w1p, b1p, w2p, b2p, w3p, b3p)


def init_decoder_params(key, latent_dim, hidden_dim, output_dim):
    """PyTorch-style nn.Linear init; weights stored transposed as (in, out)."""
    k1, k2, k3, k4, k5, k6 = jax.random.split(key, 6)

    def linear_init(kw, kb, fan_in, fan_out):
        bound = 1.0 / jnp.sqrt(fan_in)
        w = jax.random.uniform(kw, (fan_in, fan_out), jnp.float32, -bound, bound)
        b = jax.random.uniform(kb, (1, fan_out), jnp.float32, -bound, bound)
        return w, b

    w1, b1 = linear_init(k1, k2, latent_dim, hidden_dim)
    w2, b2 = linear_init(k3, k4, hidden_dim, hidden_dim)
    w3, b3 = linear_init(k5, k6, hidden_dim, output_dim)
    return {"w1": w1, "b1": b1, "w2": w2, "b2": b2, "w3": w3, "b3": b3}


def decoder_reference(x, params):
    """Pure-JAX f32 reference for correctness check."""
    h = _leaky_relu(x @ params["w1"] + params["b1"])
    h = _leaky_relu(h @ params["w2"] + params["b2"])
    return jax.nn.sigmoid(h @ params["w3"] + params["b3"])


if __name__ == "__main__":
    latent_dim, hidden_dim, output_dim = 8, 32, 64
    batch = 1024   # -> 2 grid steps of 512 rows: exercises pipelining + parallel axis

    key = jax.random.PRNGKey(0)
    k_params, k_x = jax.random.split(key)

    params = init_decoder_params(k_params, latent_dim, hidden_dim, output_dim)
    x = jax.random.normal(k_x, (batch, latent_dim), jnp.float32)

    prepared = prepare_decoder_params(params)   # pad + bf16 cast ONCE, not per call
    fwd = jax.jit(decoder_forward)

    out = jax.block_until_ready(fwd(x, prepared))
    ref = decoder_reference(x, params)

    assert out.shape == (batch, output_dim)
    # bf16 matmul inputs vs f32 reference -> loose tolerance (sigmoid is exact).
    max_err = float(jnp.max(jnp.abs(out - ref)))
    assert max_err < 2e-2, max_err

    print("KERNEL_OK")
</pallas_src>

<mosaic_0001>
module attributes {stable_mosaic.version = 11 : i64} {
  func.func @decoder_kernel(%arg0: i32, %arg1: memref<512x8xf32, #tpu.memory_space<vmem>>, %arg2: memref<8x128xbf16, #tpu.memory_space<vmem>>, %arg3: memref<1x128xf32, #tpu.memory_space<vmem>>, %arg4: memref<128x128xbf16, #tpu.memory_space<vmem>>, %arg5: memref<1x128xf32, #tpu.memory_space<vmem>>, %arg6: memref<128x64xbf16, #tpu.memory_space<vmem>>, %arg7: memref<1x64xf32, #tpu.memory_space<vmem>>, %arg8: memref<512x64xf32, #tpu.memory_space<vmem>>) attributes {dimension_semantics = [#tpu.dimension_semantics<parallel>], iteration_bounds = array<i64: 2>, scalar_prefetch = 0 : i64, scratch_operands = 0 : i64, tpu.core_type = #tpu.core_type<tc>, window_params = [{transform_indices = @transform_0, window_bounds = array<i64: 512, 8>}, {pipeline_mode = #tpu.pipeline_mode<synchronous>, transform_indices = @transform_1, window_bounds = array<i64: 8, 128>}, {pipeline_mode = #tpu.pipeline_mode<synchronous>, transform_indices = @transform_2, window_bounds = array<i64: 1, 128>}, {pipeline_mode = #tpu.pipeline_mode<synchronous>, transform_indices = @transform_3, window_bounds = array<i64: 128, 128>}, {pipeline_mode = #tpu.pipeline_mode<synchronous>, transform_indices = @transform_4, window_bounds = array<i64: 1, 128>}, {pipeline_mode = #tpu.pipeline_mode<synchronous>, transform_indices = @transform_5, window_bounds = array<i64: 128, 64>}, {pipeline_mode = #tpu.pipeline_mode<synchronous>, transform_indices = @transform_6, window_bounds = array<i64: 1, 64>}, {transform_indices = @transform_7, window_bounds = array<i64: 512, 64>}]} {
    %c0 = arith.constant 0 : index
    %c0_0 = arith.constant 0 : index
    %0 = vector.load %arg1[%c0, %c0_0] : memref<512x8xf32, #tpu.memory_space<vmem>>, vector<512x8xf32>
    %1 = arith.truncf %0 : vector<512x8xf32> to vector<512x8xbf16>
    %c0_1 = arith.constant 0 : index
    %c0_2 = arith.constant 0 : index
    %2 = vector.load %arg2[%c0_1, %c0_2] : memref<8x128xbf16, #tpu.memory_space<vmem>>, vector<8x128xbf16>
    %cst = arith.constant dense<0.000000e+00> : vector<512x128xf32>
    %3 = tpu.matmul %1, %2, %cst {dimension_numbers = #tpu.dot_dimension_numbers<[1], [0], [0], [1], [0, 0, 1, 1], [], []>} : vector<512x8xbf16>, vector<8x128xbf16>, vector<512x128xf32> -> vector<512x128xf32>
    %c0_3 = arith.constant 0 : index
    %c0_4 = arith.constant 0 : index
    %4 = vector.load %arg3[%c0_3, %c0_4] : memref<1x128xf32, #tpu.memory_space<vmem>>, vector<1x128xf32>
    %5 = vector.broadcast %4 : vector<1x128xf32> to vector<512x128xf32>
    %6 = arith.addf %3, %5 : vector<512x128xf32>
    %cst_5 = arith.constant 2.000000e-01 : f32
    %7 = vector.broadcast %cst_5 : f32 to vector<512x128xf32>
    %8 = arith.mulf %7, %6 : vector<512x128xf32>
    %9 = arith.maximumf %6, %8 : vector<512x128xf32>
    %10 = arith.truncf %9 : vector<512x128xf32> to vector<512x128xbf16>
    %c0_6 = arith.constant 0 : index
    %c0_7 = arith.constant 0 : index
    %11 = vector.load %arg4[%c0_6, %c0_7] : memref<128x128xbf16, #tpu.memory_space<vmem>>, vector<128x128xbf16>
    %cst_8 = arith.constant dense<0.000000e+00> : vector<512x128xf32>
    %12 = tpu.matmul %10, %11, %cst_8 {dimension_numbers = #tpu.dot_dimension_numbers<[1], [0], [0], [1], [0, 0, 1, 1], [], []>} : vector<512x128xbf16>, vector<128x128xbf16>, vector<512x128xf32> -> vector<512x128xf32>
    %c0_9 = arith.constant 0 : index
    %c0_10 = arith.constant 0 : index
    %13 = vector.load %arg5[%c0_9, %c0_10] : memref<1x128xf32, #tpu.memory_space<vmem>>, vector<1x128xf32>
    %14 = vector.broadcast %13 : vector<1x128xf32> to vector<512x128xf32>
    %15 = arith.addf %12, %14 : vector<512x128xf32>
    %cst_11 = arith.constant 2.000000e-01 : f32
    %16 = vector.broadcast %cst_11 : f32 to vector<512x128xf32>
    %17 = arith.mulf %16, %15 : vector<512x128xf32>
    %18 = arith.maximumf %15, %17 : vector<512x128xf32>
    %19 = arith.truncf %18 : vector<512x128xf32> to vector<512x128xbf16>
    %c0_12 = arith.constant 0 : index
    %c0_13 = arith.constant 0 : index
    %20 = vector.load %arg6[%c0_12, %c0_13] : memref<128x64xbf16, #tpu.memory_space<vmem>>, vector<128x64xbf16>
    %cst_14 = arith.constant dense<0.000000e+00> : vector<512x64xf32>
    %21 = tpu.matmul %19, %20, %cst_14 {dimension_numbers = #tpu.dot_dimension_numbers<[1], [0], [0], [1], [0, 0, 1, 1], [], []>} : vector<512x128xbf16>, vector<128x64xbf16>, vector<512x64xf32> -> vector<512x64xf32>
    %c0_15 = arith.constant 0 : index
    %c0_16 = arith.constant 0 : index
    %22 = vector.load %arg7[%c0_15, %c0_16] : memref<1x64xf32, #tpu.memory_space<vmem>>, vector<1x64xf32>
    %23 = vector.broadcast %22 : vector<1x64xf32> to vector<512x64xf32>
    %24 = arith.addf %21, %23 : vector<512x64xf32>
    %cst_17 = arith.constant 0.000000e+00 : f32
    %25 = vector.broadcast %cst_17 : f32 to vector<512x64xf32>
    %26 = arith.subf %25, %24 : vector<512x64xf32>
    %27 = math.exp %26 : vector<512x64xf32>
    %cst_18 = arith.constant 1.000000e+00 : f32
    %28 = vector.broadcast %cst_18 : f32 to vector<512x64xf32>
    %29 = arith.addf %28, %27 : vector<512x64xf32>
    %cst_19 = arith.constant 1.000000e+00 : f32
    %30 = vector.broadcast %cst_19 : f32 to vector<512x64xf32>
    %31 = arith.divf %30, %29 : vector<512x64xf32>
    %c0_20 = arith.constant 0 : index
    %c0_21 = arith.constant 0 : index
    %32 = vector.load %arg8[%c0_20, %c0_21] : memref<512x64xf32, #tpu.memory_space<vmem>>, vector<512x64xf32>
    tpu.vector_store %arg8[%c0_20, %c0_21], %31 {strides = array<i32>} : memref<512x64xf32, #tpu.memory_space<vmem>>, vector<512x64xf32>,
    return
  }
  func.func @transform_0(%arg0: i32) -> (i32, i32) {
    %c0_i32 = arith.constant 0 : i32
    %c0_i32_0 = arith.constant 0 : i32
    return %arg0, %c0_i32 : i32, i32
  }
  func.func @transform_1(%arg0: i32) -> (i32, i32) {
    %c0_i32 = arith.constant 0 : i32
    %c0_i32_0 = arith.constant 0 : i32
    %c0_i32_1 = arith.constant 0 : i32
    return %c0_i32, %c0_i32_0 : i32, i32
  }
  func.func @transform_2(%arg0: i32) -> (i32, i32) {
    %c0_i32 = arith.constant 0 : i32
    %c0_i32_0 = arith.constant 0 : i32
    %c0_i32_1 = arith.constant 0 : i32
    return %c0_i32, %c0_i32_0 : i32, i32
  }
  func.func @transform_3(%arg0: i32) -> (i32, i32) {
    %c0_i32 = arith.constant 0 : i32
    %c0_i32_0 = arith.constant 0 : i32
    %c0_i32_1 = arith.constant 0 : i32
    return %c0_i32, %c0_i32_0 : i32, i32
  }
  func.func @transform_4(%arg0: i32) -> (i32, i32) {
    %c0_i32 = arith.constant 0 : i32
    %c0_i32_0 = arith.constant 0 : i32
    %c0_i32_1 = arith.constant 0 : i32
    return %c0_i32, %c0_i32_0 : i32, i32
  }
  func.func @transform_5(%arg0: i32) -> (i32, i32) {
    %c0_i32 = arith.constant 0 : i32
    %c0_i32_0 = arith.constant 0 : i32
    %c0_i32_1 = arith.constant 0 : i32
    return %c0_i32, %c0_i32_0 : i32, i32
  }
  func.func @transform_6(%arg0: i32) -> (i32, i32) {
    %c0_i32 = arith.constant 0 : i32
    %c0_i32_0 = arith.constant 0 : i32
    %c0_i32_1 = arith.constant 0 : i32
    return %c0_i32, %c0_i32_0 : i32, i32
  }
  func.func @transform_7(%arg0: i32) -> (i32, i32) {
    %c0_i32 = arith.constant 0 : i32
    %c0_i32_0 = arith.constant 0 : i32
    return %arg0, %c0_i32 : i32, i32
  }
}

</mosaic_0001>

<bundles_post_ra>
// kernel: decoder_forward.1
= control target key start
LH: loop header
LB: loop body
LE: loop exit
PB: predicated region body
PF: predicated region fallthrough
CT: control target
= control target key end

     0   :  { %s3056_s24 = smov 0   ;;  %s3593_s0 = inlined_call_operand.vmem [shape: f32[1024,8], index: 0, kind: input, shape index: {}]   ;;  %s3594_s1 = inlined_call_operand.vmem [shape: bf16[8,128], index: 1, kind: input, shape index: {}]   ;;  %s3595_s2 = inlined_call_operand.vmem [shape: f32[1,128], index: 2, kind: input, shape index: {}]   ;;  %s3596_s3 = inlined_call_operand.vmem [shape: bf16[128,128], index: 3, kind: input, shape index: {}]   ;;  %s3597_s4 = inlined_call_operand.vmem [shape: f32[1,128], index: 4, kind: input, shape index: {}]   ;;  %s3598_s5 = inlined_call_operand.vmem [shape: bf16[128,64], index: 5, kind: input, shape index: {}]   ;;  %s3599_s6 = inlined_call_operand.vmem [shape: f32[1,64], index: 6, kind: input, shape index: {}]   ;;  %s3600_s7 = inlined_call_operand.vmem [shape: f32[1024,64], index: 7, kind: output, shape index: {}]  }
   0x1 LB: > { %s2322_s25 = sadd.s32 4294967295, %s3014_s24   ;;  %p2326_p0 = scmp.ge.s32.totalorder %s3014_s24, 1  ;;  %s3014_s24 = sphi %s3056_s24, %s17_s24  }
   0x2   : > { %p238_p1 = scmp.lt.s32.totalorder %s3014_s24, 3 }
   0x4   : > { %p239_p2 = pnand %p2326_p0, %p238_p1 }
   0x5   : > { %v379_v0 = vld [vmem:[%s3594_s1] sm:$0xf] (!%p239_p2)  ;;  %vm484_vm0 = vcmask (!%p239_p2), 1043456   ;;  %s2327_s28 = sshll.u32 (!%p239_p2), %s2322_s25, 6  ;;  %vm387_vm1 = vcmask (!%p239_p2), 64512   ;;  %v2736_v29 = vld [vmem:[%s3596_s3 + $0x8] sm:$0xff] (!%p239_p2)  }
   0x6   : > { %242 = sbr.rel (%p239_p2) target bundleno = 840 (0x348), region = 48  ;;  %v2735_v1 = vld [vmem:[%s3596_s3] sm:$0xff] (!%p239_p2)   ;;  %2725 = vmatprep.subr.msk.bf16.mxu0 (!%p239_p2), %vm484_vm0, %v379_v0  ;;  %v486_v2 = vsel (!%p239_p2), %vm484_vm0, %v379_v0, 0  ;;  %p271_p3 = scmp.lt.s32.totalorder (!%p239_p2), %s2327_s28, 127  ;;  %2726 = vmatprep.subr.msk.bf16.mxu1 (!%p239_p2), %vm484_vm0, %v379_v0  ;;  %v2737_v38 = vld [vmem:[%s3596_s3 + $0x10] sm:$0xff] (!%p239_p2)   ;;  %v2738_v40 = vld [vmem:[%s3596_s3 + $0x18] sm:$0xff] (!%p239_p2)  }
   0x7   : > { %2498 = vmatpush3.bf16.msra.mxu0 (!%p239_p2), %v486_v2  ;;  %2724 = vmatpush3.bf16.msra.mxu1 (!%p239_p2), %v486_v2  ;;  %v2739_v50 = vld [vmem:[%s3596_s3 + $0x20] sm:$0xff] (!%p239_p2)   ;;  %v2740_v57 = vld [vmem:[%s3596_s3 + $0x28] sm:$0xff] (!%p239_p2)   ;;  %v2741_v2 = vld [vmem:[%s3596_s3 + $0x30] sm:$0xff] (!%p239_p2)   ;;  %vm2201_vm2 = vcmask (!%p239_p2), 523264  }
   0x8   : > { %2563 = vmatprep.subr.bf16.mxu1 (!%p239_p2), %v2735_v1 }
   0xd   : > { %s3602_s28 = smov (!%p271_p3, %s2327_s28), 127 }
   0xe   : > { %s2328_s8 = sshll.u32 %s3602_s28, 3 }
   0xf   : > { %s3078_s11 = scalar_lea.vmem %s3593_s0, %s2328_s8  ;;  %s3414_s10 = scalar_lea.vmem %s3600_s7, %s2328_s8 }
  0x10   : > { %v283_v3 = vld [vmem:[%s3078_s11] sm:$0xff]  ;;  %v284_v4 = vld [vmem:[%s3078_s11 + $0x8] sm:$0xff]  ;;  %v285_v5 = vld [vmem:[%s3078_s11 + $0x10] sm:$0xff] }
  0x11   : > { %v347_v6 = vpack.c.bf16 %v284_v4, %v283_v3  ;;  %v286_v7 = vld [vmem:[%s3078_s11 + $0x18] sm:$0xff]  ;;  %v287_v8 = vld [vmem:[%s3078_s11 + $0x20] sm:$0xff]  ;;  %v288_v9 = vld [vmem:[%s3078_s11 + $0x28] sm:$0xff] }
  0x12   : > { %v348_v10 = vpack.c.bf16 %v286_v7, %v285_v5  ;;  %v349_v11 = vpack.c.bf16 %v288_v9, %v287_v8  ;;  %v289_v12 = vld [vmem:[%s3078_s11 + $0x30] sm:$0xff]  ;;  %v290_v13 = vld [vmem:[%s3078_s11 + $0x38] sm:$0xff]  ;;  %v291_v14 = vld [vmem:[%s3078_s11 + $0x40] sm:$0xff] }
  0x13   : > { %2499 = vmatprep.mubr.msk.bf16.mxu0 %vm387_vm1, %v347_v6  ;;  %v292_v15 = vld [vmem:[%s3078_s11 + $0x48] sm:$0xff]  ;;  %v350_v16 = vpack.c.bf16 %v290_v13, %v289_v12  ;;  %v315_v18 = vld [vmem:[%s3078_s11 + $0x100] sm:$0xff]  ;;  %v317_v20 = vld [vmem:[%s3078_s11 + $0x110] sm:$0xff] }
  0x14   : > { %2500 = vmatmul.mubr.msk.bf16.vlgmr.msra.gmra.mrb[0].mxu0 %vm387_vm1, %v348_v10  ;;  %v351_v17 = vpack.c.bf16 %v292_v15, %v291_v14  ;;  %v316_v19 = vld [vmem:[%s3078_s11 + $0x108] sm:$0xff]  ;;  %v318_v21 = vld [vmem:[%s3078_s11 + $0x118] sm:$0xff]  ;;  %v319_v24 = vld [vmem:[%s3078_s11 + $0x120] sm:$0xff] }
  0x15   : > { %2503 = vmatprep.mubr.msk.bf16.mxu0 %vm387_vm1, %v349_v11  ;;  %v363_v22 = vpack.c.bf16 %v316_v19, %v315_v18  ;;  %v364_v23 = vpack.c.bf16 %v318_v21, %v317_v20  ;;  %v320_v25 = vld [vmem:[%s3078_s11 + $0x128] sm:$0xff]  ;;  %v293_v26 = vld [vmem:[%s3078_s11 + $0x50] sm:$0xff]  ;;  %v294_v27 = vld [vmem:[%s3078_s11 + $0x58] sm:$0xff] }
  0x16   : > { %v365_v28 = vpack.c.bf16 %v320_v25, %v319_v24  ;;  %v295_v30 = vld [vmem:[%s3078_s11 + $0x60] sm:$0xff]  ;;  %v296_v31 = vld [vmem:[%s3078_s11 + $0x68] sm:$0xff]  ;;  %v352_v32 = vpack.c.bf16 %v294_v27, %v293_v26  ;;  %v321_v33 = vld [vmem:[%s3078_s11 + $0x130] sm:$0xff] }
  0x17   : > { %2531 = vmatprep.mubr.msk.bf16.mxu1 %vm387_vm1, %v363_v22  ;;  %v322_v34 = vld [vmem:[%s3078_s11 + $0x138] sm:$0xff]  ;;  %v353_v35 = vpack.c.bf16 %v296_v31, %v295_v30  ;;  %v323_v36 = vld [vmem:[%s3078_s11 + $0x140] sm:$0xff]  ;;  %v324_v37 = vld [vmem:[%s3078_s11 + $0x148] sm:$0xff] }
  0x18   : > { %2532 = vmatmul.mubr.msk.bf16.vlgmr.msra.gmra.mrb[0].mxu1 %vm387_vm1, %v364_v23  ;;  %v366_v39 = vpack.c.bf16 %v322_v34, %v321_v33  ;;  %v297_v41 = vld [vmem:[%s3078_s11 + $0x70] sm:$0xff]  ;;  %v298_v42 = vld [vmem:[%s3078_s11 + $0x78] sm:$0xff]  ;;  %v299_v43 = vld [vmem:[%s3078_s11 + $0x80] sm:$0xff]  ;;  %v367_v44 = vpack.c.bf16 %v324_v37, %v323_v36 }
  0x19   : > { %2535 = vmatprep.mubr.msk.bf16.mxu1 %vm387_vm1, %v365_v28  ;;  %2564 = vmatpush3.bf16.msra.mxu1 %v2735_v1  ;;  %v300_v45 = vld [vmem:[%s3078_s11 + $0x88] sm:$0xff]  ;;  %v325_v46 = vld [vmem:[%s3078_s11 + $0x150] sm:$0xff]  ;;  %v326_v47 = vld [vmem:[%s3078_s11 + $0x158] sm:$0xff]  ;;  %v354_v51 = vpack.c.bf16 %v298_v42, %v297_v41 }
  0x1a   : > { %2565 = vmatprep.subr.bf16.mxu1 %v2736_v29  ;;  %v327_v48 = vld [vmem:[%s3078_s11 + $0x160] sm:$0xff]  ;;  %v328_v49 = vld [vmem:[%s3078_s11 + $0x168] sm:$0xff]  ;;  %v355_v52 = vpack.c.bf16 %v300_v45, %v299_v43  ;;  %v368_v53 = vpack.c.bf16 %v326_v47, %v325_v46  ;;  %v301_v55 = vld [vmem:[%s3078_s11 + $0x90] sm:$0xff] }
  0x1b   : > { %v369_v54 = vpack.c.bf16 %v328_v49, %v327_v48  ;;  %v302_v56 = vld [vmem:[%s3078_s11 + $0x98] sm:$0xff]  ;;  %v303_v58 = vld [vmem:[%s3078_s11 + $0xa0] sm:$0xff]  ;;  %v304_v59 = vld [vmem:[%s3078_s11 + $0xa8] sm:$0xff] }
  0x1c   : > { %2504 = vmatmul.mubr.msk.bf16.gmra.mrb[4].mxu0 %vm387_vm1, %v350_v16  ;;  %v356_v60 = vpack.c.bf16 %v302_v56, %v301_v55  ;;  %v329_v61 = vld [vmem:[%s3078_s11 + $0x170] sm:$0xff]  ;;  %v330_v62 = vld [vmem:[%s3078_s11 + $0x178] sm:$0xff]  ;;  %v357_v63 = vpack.c.bf16 %v304_v59, %v303_v58  ;;  %v331_v0 = vld [vmem:[%s3078_s11 + $0x180] sm:$0xff] }
  0x1d   : > { %2507 = vmatprep.mubr.msk.bf16.mxu0 %vm387_vm1, %v351_v17  ;;  %2566 = vmatpush3.bf16.msra.mxu1 %v2736_v29  ;;  %v332_v1 = vld [vmem:[%s3078_s11 + $0x188] sm:$0xff]  ;;  %v370_v3 = vpack.c.bf16 %v330_v62, %v329_v61  ;;  %v305_v5 = vld [vmem:[%s3078_s11 + $0xb0] sm:$0xff]  ;;  %v306_v6 = vld [vmem:[%s3078_s11 + $0xb8] sm:$0xff] }
  0x1e   : > { %2567 = vmatprep.subr.bf16.mxu1 %v2737_v38  ;;  %v371_v4 = vpack.c.bf16 %v332_v1, %v331_v0  ;;  %v307_v7 = vld [vmem:[%s3078_s11 + $0xc0] sm:$0xff]  ;;  %v308_v8 = vld [vmem:[%s3078_s11 + $0xc8] sm:$0xff]  ;;  %v358_v9 = vpack.c.bf16 %v306_v6, %v305_v5  ;;  %v333_v10 = vld [vmem:[%s3078_s11 + $0x190] sm:$0xff] }
  0x1f   : > { %v334_v11 = vld [vmem:[%s3078_s11 + $0x198] sm:$0xff]  ;;  %v359_v12 = vpack.c.bf16 %v308_v8, %v307_v7  ;;  %v335_v13 = vld [vmem:[%s3078_s11 + $0x1a0] sm:$0xff]  ;;  %v336_v14 = vld [vmem:[%s3078_s11 + $0x1a8] sm:$0xff] }
  0x20   : > { %2536 = vmatmul.mubr.msk.bf16.gmra.mrb[4].mxu1 %vm387_vm1, %v366_v39  ;;  %v372_v15 = vpack.c.bf16 %v334_v11, %v333_v10  ;;  %v373_v16 = vpack.c.bf16 %v336_v14, %v335_v13  ;;  %v309_v17 = vld [vmem:[%s3078_s11 + $0xd0] sm:$0xff]  ;;  %v310_v18 = vld [vmem:[%s3078_s11 + $0xd8] sm:$0xff]  ;;  %v311_v19 = vld [vmem:[%s3078_s11 + $0xe0] sm:$0xff] }
  0x21   : > { %2539 = vmatprep.mubr.msk.bf16.mxu1 %vm387_vm1, %v367_v44  ;;  %2568 = vmatpush3.bf16.msra.mxu1 %v2737_v38  ;;  %v312_v20 = vld [vmem:[%s3078_s11 + $0xe8] sm:$0xff]  ;;  %v360_v21 = vpack.c.bf16 %v310_v18, %v309_v17  ;;  %v337_v22 = vld [vmem:[%s3078_s11 + $0x1b0] sm:$0xff]  ;;  %v338_v23 = vld [vmem:[%s3078_s11 + $0x1b8] sm:$0xff] }
  0x22   : > { %2569 = vmatprep.subr.bf16.mxu1 %v2738_v40  ;;  %v361_v24 = vpack.c.bf16 %v312_v20, %v311_v19  ;;  %v339_v25 = vld [vmem:[%s3078_s11 + $0x1c0] sm:$0xff]  ;;  %v340_v26 = vld [vmem:[%s3078_s11 + $0x1c8] sm:$0xff]  ;;  %v374_v27 = vpack.c.bf16 %v338_v23, %v337_v22  ;;  %v313_v29 = vld [vmem:[%s3078_s11 + $0xf0] sm:$0xff] }
  0x23   : > { %v375_v28 = vpack.c.bf16 %v340_v26, %v339_v25  ;;  %v314_v30 = vld [vmem:[%s3078_s11 + $0xf8] sm:$0xff]  ;;  %v343_v34 = vld [vmem:[%s3078_s11 + $0x1e0] sm:$0xff]  ;;  %v345_v38 = vld [vmem:[%s3078_s11 + $0x1f0] sm:$0xff] }
  0x24   : > { %2508 = vmatmul.mubr.msk.bf16.gmra.mrb[8].mxu0 %vm387_vm1, %v352_v32  ;;  %v362_v31 = vpack.c.bf16 %v314_v30, %v313_v29  ;;  %v341_v32 = vld [vmem:[%s3078_s11 + $0x1d0] sm:$0xff]  ;;  %v342_v33 = vld [vmem:[%s3078_s11 + $0x1d8] sm:$0xff]  ;;  %v3200_v42 = vld [vmem:[%s3595_s2] ss:$0 sm:$0xff] }
  0x25   : > { %2511 = vmatprep.mubr.msk.bf16.mxu0 %vm387_vm1, %v353_v35  ;;  %2570 = vmatpush3.bf16.msra.mxu1 %v2738_v40  ;;  %v344_v35 = vld [vmem:[%s3078_s11 + $0x1e8] sm:$0xff]  ;;  %v376_v36 = vpack.c.bf16 %v342_v33, %v341_v32  ;;  %v346_v39 = vld [vmem:[%s3078_s11 + $0x1f8] sm:$0xff]  ;;  %v2745_v1 = vld [vmem:[%s3598_s5 + $0x10] sm:$0xff]  }
  0x26   : > { %2571 = vmatprep.subr.bf16.mxu1 %v2739_v50  ;;  %v377_v37 = vpack.c.bf16 %v344_v35, %v343_v34  ;;  %v378_v40 = vpack.c.bf16 %v346_v39, %v345_v38  ;;  %v2742_v41 = vld [vmem:[%s3596_s3 + $0x38] sm:$0xff]   ;;  %v2744_v55 = vld [vmem:[%s3598_s5 + $0x8] sm:$0xff]   ;;  %v2747_v35 = vld [vmem:[%s3598_s5 + $0x20] sm:$0xff]  }
  0x28   : > { %2540 = vmatmul.mubr.msk.bf16.gmra.mrb[8].mxu1 %vm387_vm1, %v368_v53 }
  0x29   : > { %2543 = vmatprep.mubr.msk.bf16.mxu1 %vm387_vm1, %v369_v54  ;;  %2572 = vmatpush3.bf16.msra.mxu1 %v2739_v50  ;;  %v2743_v54 = vld [vmem:[%s3598_s5] sm:$0xff]  }
  0x2a   : > { %2573 = vmatprep.subr.bf16.mxu1 %v2740_v57  ;;  %2643 = vmatprep.subr.bf16.mxu0 %v2743_v54 }
  0x2b   : > { %2644 = vmatpush3.bf16.msra.mxu0 %v2743_v54 }
  0x2c   : > { %2512 = vmatmul.mubr.msk.bf16.gmra.mrb[12].mxu0 %vm387_vm1, %v354_v51  ;;  %2645 = vmatprep.subr.bf16.mxu0 %v2744_v55 }
  0x2d   : > { %2515 = vmatprep.mubr.msk.bf16.mxu0 %vm387_vm1, %v355_v52  ;;  %2574 = vmatpush3.bf16.msra.mxu1 %v2740_v57 }
  0x2e   : > { %2575 = vmatprep.subr.bf16.mxu1 %v2741_v2 }
  0x2f   : > { %2646 = vmatpush3.bf16.msra.mxu0 %v2744_v55  ;;  %v2748_v55 = vld [vmem:[%s3598_s5 + $0x28] sm:$0xff]  }
  0x30   : > { %2544 = vmatmul.mubr.msk.bf16.gmra.mrb[12].mxu1 %vm387_vm1, %v370_v3  ;;  %2647 = vmatprep.subr.bf16.mxu0 %v2745_v1 }
  0x31   : > { %2547 = vmatprep.mubr.msk.bf16.mxu1 %vm387_vm1, %v371_v4  ;;  %2576 = vmatpush3.bf16.msra.mxu1 %v2741_v2 }
  0x32   : > { %2577 = vmatprep.subr.bf16.mxu1 %v2742_v41 }
  0x33   : > { %2648 = vmatpush3.bf16.msra.mxu0 %v2745_v1 }
  0x34   : > { %2516 = vmatmul.mubr.msk.bf16.gmra.mrb[16].mxu0 %vm387_vm1, %v356_v60 }
  0x35   : > { %2519 = vmatprep.mubr.msk.bf16.mxu0 %vm387_vm1, %v357_v63  ;;  %2578 = vmatpush3.bf16.msra.mxu1 %v2742_v41 }
  0x38   : > { %2548 = vmatmul.mubr.msk.bf16.gmra.mrb[16].mxu1 %vm387_vm1, %v372_v15 }
  0x39   : > { %2551 = vmatprep.mubr.msk.bf16.mxu1 %vm387_vm1, %v373_v16  ;;  %v2746_v16 = vld [vmem:[%s3598_s5 + $0x18] sm:$0xff]  }
  0x3a   : > { %2649 = vmatprep.subr.bf16.mxu0 %v2746_v16 }
  0x3b   : > { %2650 = vmatpush3.bf16.msra.mxu0 %v2746_v16 }
  0x3c   : > { %2520 = vmatmul.mubr.msk.bf16.gmra.mrb[20].mxu0 %vm387_vm1, %v358_v9  ;;  %2651 = vmatprep.subr.bf16.mxu0 %v2747_v35 }
  0x3d   : > { %2523 = vmatprep.mubr.msk.bf16.mxu0 %vm387_vm1, %v359_v12 }
  0x3f   : > { %2652 = vmatpush3.bf16.msra.mxu0 %v2747_v35 }
  0x40   : > { %2552 = vmatmul.mubr.msk.bf16.gmra.mrb[20].mxu1 %vm387_vm1, %v374_v27  ;;  %2653 = vmatprep.subr.bf16.mxu0 %v2748_v55 }
  0x41   : > { %2555 = vmatprep.mubr.msk.bf16.mxu1 %vm387_vm1, %v375_v28 }
  0x43   : > { %2654 = vmatpush3.bf16.msra.mxu0 %v2748_v55 }
  0x44   : > { %2524 = vmatmul.mubr.msk.bf16.gmra.mrb[24].mxu0 %vm387_vm1, %v360_v21 }
  0x45   : > { %2527 = vmatprep.mubr.msk.bf16.mxu0 %vm387_vm1, %v361_v24 }
  0x48   : > { %2556 = vmatmul.mubr.msk.bf16.gmra.mrb[24].mxu1 %vm387_vm1, %v376_v36 }
  0x49   : > { %2559 = vmatprep.mubr.msk.bf16.mxu1 %vm387_vm1, %v377_v37 }
  0x4c   : > { %2528 = vmatmul.mubr.msk.bf16.gmra.mrb[28].mxu0 %vm387_vm1, %v362_v31 }
  0x50   : > { %2560 = vmatmul.mubr.msk.bf16.gmra.mrb[28].mxu1 %vm387_vm1, %v378_v40 }
  0xe7   : > { %v2501_v43 = vpop.f32.mrb[0].mxu0 }
  0xe8   : > { %v531_v44 = vadd.f32 %v2501_v43, %v3200_v42  ;;  %v522_v45 = vpop.f32.mrb[1].mxu0 }
  0xe9   : > { %v523_v46 = vadd.f32 %v3200_v42, %v522_v45  ;;  %v2502_v47 = vpop.f32.mrb[2].mxu0 }
  0xea   : > { %v779_v48 = vmul.f32 0.2, %v531_v44  ;;  %v534_v49 = vadd.f32 %v2502_v47, %v3200_v42  ;;  %v525_v50 = vpop.f32.mrb[3].mxu0 }
  0xeb   : > { %v777_v51 = vmul.f32 0.2, %v523_v46  ;;  %v526_v52 = vadd.f32 %v3200_v42, %v525_v50  ;;  %v2533_v8 = vpop.f32.mrb[0].mxu1 }
  0xec   : > { %v780_v53 = vmul.f32 0.2, %v534_v49  ;;  %v843_v57 = vmax.f32 %v531_v44, %v779_v48  ;;  %v659_v11 = vadd.f32 %v2533_v8, %v3200_v42  ;;  %v650_v12 = vpop.f32.mrb[1].mxu1 }
  0xed   : > { %v778_v56 = vmul.f32 0.2, %v526_v52  ;;  %v841_v59 = vmax.f32 %v523_v46, %v777_v51  ;;  %v651_v14 = vadd.f32 %v3200_v42, %v650_v12  ;;  %v2534_v15 = vpop.f32.mrb[2].mxu1 }
  0xee   : > { %v844_v58 = vmax.f32 %v534_v49, %v780_v53  ;;  %v811_v18 = vmul.f32 0.2, %v659_v11  ;;  %v662_v19 = vadd.f32 %v2534_v15, %v3200_v42  ;;  %v653_v20 = vpop.f32.mrb[3].mxu1 }
  0xef   : > { %v842_v60 = vmax.f32 %v526_v52, %v778_v56  ;;  %v2505_v61 = vpop.f32.mrb[4].mxu0  ;;  %v809_v23 = vmul.f32 0.2, %v651_v14  ;;  %v654_v24 = vadd.f32 %v3200_v42, %v653_v20 }
  0xf0   : > { %v906_v62 = vpack.c.bf16 %v844_v58, %v843_v57  ;;  %v547_v63 = vadd.f32 %v2505_v61, %v3200_v42  ;;  %v538_v0 = vpop.f32.mrb[5].mxu0  ;;  %v875_v28 = vmax.f32 %v659_v11, %v811_v18  ;;  %v812_v29 = vmul.f32 0.2, %v662_v19 }
  0xf1   : > { %v539_v2 = vadd.f32 %v3200_v42, %v538_v0  ;;  %v2506_v3 = vpop.f32.mrb[6].mxu0  ;;  %v905_v4 = vpack.c.bf16 %v842_v60, %v841_v59  ;;  %v873_v33 = vmax.f32 %v651_v14, %v809_v23  ;;  %v810_v34 = vmul.f32 0.2, %v654_v24 }
  0xf2   : > { %v783_v5 = vmul.f32 0.2, %v547_v63  ;;  %v550_v6 = vadd.f32 %v2506_v3, %v3200_v42  ;;  %v541_v7 = vpop.f32.mrb[7].mxu0  ;;  %v876_v39 = vmax.f32 %v662_v19, %v812_v29 }
  0xf3   : > { %v781_v9 = vmul.f32 0.2, %v539_v2  ;;  %v542_v10 = vadd.f32 %v3200_v42, %v541_v7  ;;  %2579 = vmatprep.mubr.bf16.mxu1 %v905_v4  ;;  %v874_v44 = vmax.f32 %v654_v24, %v810_v34  ;;  %v2537_v45 = vpop.f32.mrb[4].mxu1 }
  0xf4   : > { %v784_v13 = vmul.f32 0.2, %v550_v6  ;;  %2580 = vmatmul.mubr.bf16.vlgmr.msra.gmra.mrb[32].mxu1 %v906_v62  ;;  %v847_v21 = vmax.f32 %v547_v63, %v783_v5  ;;  %v675_v48 = vadd.f32 %v2537_v45, %v3200_v42  ;;  %v666_v49 = vpop.f32.mrb[5].mxu1  ;;  %v3234_v50 = vpack.c.bf16 %v876_v39, %v875_v28 }
  0xf5   : > { %v782_v17 = vmul.f32 0.2, %v542_v10  ;;  %v845_v25 = vmax.f32 %v539_v2, %v781_v9  ;;  %v667_v52 = vadd.f32 %v3200_v42, %v666_v49  ;;  %v2538_v53 = vpop.f32.mrb[6].mxu1  ;;  %v3237_v54 = vpack.c.bf16 %v874_v44, %v873_v33 }
  0xf6   : > { %v848_v22 = vmax.f32 %v550_v6, %v784_v13  ;;  %v815_v57 = vmul.f32 0.2, %v675_v48  ;;  %v678_v58 = vadd.f32 %v2538_v53, %v3200_v42  ;;  %v669_v59 = vpop.f32.mrb[7].mxu1 }
  0xf7   : > { %v846_v26 = vmax.f32 %v542_v10, %v782_v17  ;;  %v2509_v27 = vpop.f32.mrb[8].mxu0  ;;  %v813_v62 = vmul.f32 0.2, %v667_v52  ;;  %v670_v63 = vadd.f32 %v3200_v42, %v669_v59  ;;  %v2749_v10 = vld [vmem:[%s3598_s5 + $0x30] sm:$0xff]  }
  0xf8   : > { %v563_v30 = vadd.f32 %v2509_v27, %v3200_v42  ;;  %v554_v31 = vpop.f32.mrb[9].mxu0  ;;  %v908_v32 = vpack.c.bf16 %v848_v22, %v847_v21  ;;  %v879_v3 = vmax.f32 %v675_v48, %v815_v57  ;;  %v816_v4 = vmul.f32 0.2, %v678_v58  ;;  %2655 = vmatprep.subr.bf16.mxu0 %v2749_v10 }
  0xf9   : > { %v555_v36 = vadd.f32 %v3200_v42, %v554_v31  ;;  %v2510_v37 = vpop.f32.mrb[10].mxu0  ;;  %v907_v38 = vpack.c.bf16 %v846_v26, %v845_v25  ;;  %v877_v8 = vmax.f32 %v667_v52, %v813_v62  ;;  %v814_v9 = vmul.f32 0.2, %v670_v63  ;;  %2656 = vmatpush3.bf16.msra.mxu0 %v2749_v10 }
  0xfa   : > { %v787_v40 = vmul.f32 0.2, %v563_v30  ;;  %v566_v41 = vadd.f32 %v2510_v37, %v3200_v42  ;;  %v557_v43 = vpop.f32.mrb[11].mxu0  ;;  %v880_v14 = vmax.f32 %v678_v58, %v816_v4 }
  0xfb   : > { %v785_v46 = vmul.f32 0.2, %v555_v36  ;;  %v558_v47 = vadd.f32 %v3200_v42, %v557_v43  ;;  %2583 = vmatprep.mubr.bf16.mxu1 %v907_v38  ;;  %v878_v18 = vmax.f32 %v670_v63, %v814_v9  ;;  %v2541_v19 = vpop.f32.mrb[8].mxu1 }
  0xfc   : > { %v788_v51 = vmul.f32 0.2, %v566_v41  ;;  %2584 = vmatmul.mubr.bf16.gmra.mrb[36].mxu1 %v908_v32  ;;  %v851_v60 = vmax.f32 %v563_v30, %v787_v40  ;;  %v691_v22 = vadd.f32 %v2541_v19, %v3200_v42  ;;  %v682_v23 = vpop.f32.mrb[9].mxu1  ;;  %v3252_v24 = vpack.c.bf16 %v880_v14, %v879_v3 }
  0xfd   : > { %v786_v56 = vmul.f32 0.2, %v558_v47  ;;  %v849_v0 = vmax.f32 %v555_v36, %v785_v46  ;;  %v683_v26 = vadd.f32 %v3200_v42, %v682_v23  ;;  %v2542_v27 = vpop.f32.mrb[10].mxu1  ;;  %v3255_v28 = vpack.c.bf16 %v878_v18, %v877_v8 }
  0xfe   : > { %v852_v61 = vmax.f32 %v566_v41, %v788_v51  ;;  %v819_v30 = vmul.f32 0.2, %v691_v22  ;;  %v694_v31 = vadd.f32 %v2542_v27, %v3200_v42  ;;  %v685_v32 = vpop.f32.mrb[11].mxu1 }
  0xff   : > { %v850_v1 = vmax.f32 %v558_v47, %v786_v56  ;;  %v2513_v2 = vpop.f32.mrb[12].mxu0  ;;  %v817_v35 = vmul.f32 0.2, %v683_v26  ;;  %v686_v36 = vadd.f32 %v3200_v42, %v685_v32 }
 0x100   : > { %v579_v5 = vadd.f32 %v2513_v2, %v3200_v42  ;;  %v570_v6 = vpop.f32.mrb[13].mxu0  ;;  %v910_v7 = vpack.c.bf16 %v852_v61, %v851_v60  ;;  %v883_v40 = vmax.f32 %v691_v22, %v819_v30  ;;  %v820_v41 = vmul.f32 0.2, %v694_v31 }
 0x101   : > { %v571_v11 = vadd.f32 %v3200_v42, %v570_v6  ;;  %v2514_v12 = vpop.f32.mrb[14].mxu0  ;;  %v909_v13 = vpack.c.bf16 %v850_v1, %v849_v0  ;;  %v881_v46 = vmax.f32 %v683_v26, %v817_v35  ;;  %v818_v47 = vmul.f32 0.2, %v686_v36 }
 0x102   : > { %v791_v15 = vmul.f32 0.2, %v579_v5  ;;  %v582_v16 = vadd.f32 %v2514_v12, %v3200_v42  ;;  %v573_v17 = vpop.f32.mrb[15].mxu0  ;;  %v884_v52 = vmax.f32 %v694_v31, %v820_v41 }
 0x103   : > { %v789_v20 = vmul.f32 0.2, %v571_v11  ;;  %v574_v21 = vadd.f32 %v3200_v42, %v573_v17  ;;  %2587 = vmatprep.mubr.bf16.mxu1 %v909_v13  ;;  %v882_v57 = vmax.f32 %v686_v36, %v818_v47  ;;  %v2545_v58 = vpop.f32.mrb[12].mxu1 }
 0x104   : > { %v792_v25 = vmul.f32 0.2, %v582_v16  ;;  %2588 = vmatmul.mubr.bf16.gmra.mrb[40].mxu1 %v910_v7  ;;  %v855_v33 = vmax.f32 %v579_v5, %v791_v15  ;;  %v707_v61 = vadd.f32 %v2545_v58, %v3200_v42  ;;  %v698_v62 = vpop.f32.mrb[13].mxu1  ;;  %v3264_v63 = vpack.c.bf16 %v884_v52, %v883_v40 }
 0x105   : > { %v790_v29 = vmul.f32 0.2, %v574_v21  ;;  %v853_v37 = vmax.f32 %v571_v11, %v789_v20  ;;  %v699_v1 = vadd.f32 %v3200_v42, %v698_v62  ;;  %v2546_v2 = vpop.f32.mrb[14].mxu1  ;;  %v3267_v3 = vpack.c.bf16 %v882_v57, %v881_v46 }
 0x106   : > { %v856_v34 = vmax.f32 %v582_v16, %v792_v25  ;;  %v823_v5 = vmul.f32 0.2, %v707_v61  ;;  %v710_v6 = vadd.f32 %v2546_v2, %v3200_v42  ;;  %v701_v7 = vpop.f32.mrb[15].mxu1 }
 0x107   : > { %v854_v38 = vmax.f32 %v574_v21, %v790_v29  ;;  %v2517_v39 = vpop.f32.mrb[16].mxu0  ;;  %v821_v10 = vmul.f32 0.2, %v699_v1  ;;  %v702_v11 = vadd.f32 %v3200_v42, %v701_v7 }
 0x108   : > { %v595_v43 = vadd.f32 %v2517_v39, %v3200_v42  ;;  %v586_v44 = vpop.f32.mrb[17].mxu0  ;;  %v912_v45 = vpack.c.bf16 %v856_v34, %v855_v33  ;;  %v887_v15 = vmax.f32 %v707_v61, %v823_v5  ;;  %v824_v16 = vmul.f32 0.2, %v710_v6 }
 0x109   : > { %v587_v48 = vadd.f32 %v3200_v42, %v586_v44  ;;  %v2518_v49 = vpop.f32.mrb[18].mxu0  ;;  %v911_v51 = vpack.c.bf16 %v854_v38, %v853_v37  ;;  %v885_v20 = vmax.f32 %v699_v1, %v821_v10  ;;  %v822_v21 = vmul.f32 0.2, %v702_v11 }
 0x10a   : > { %v795_v53 = vmul.f32 0.2, %v595_v43  ;;  %v598_v55 = vadd.f32 %v2518_v49, %v3200_v42  ;;  %v589_v56 = vpop.f32.mrb[19].mxu0  ;;  %v888_v26 = vmax.f32 %v710_v6, %v824_v16 }
 0x10b   : > { %v793_v59 = vmul.f32 0.2, %v587_v48  ;;  %v590_v60 = vadd.f32 %v3200_v42, %v589_v56  ;;  %2591 = vmatprep.mubr.bf16.mxu1 %v911_v51  ;;  %v886_v31 = vmax.f32 %v702_v11, %v822_v21  ;;  %v2549_v32 = vpop.f32.mrb[16].mxu1 }
 0x10c   : > { %v796_v0 = vmul.f32 0.2, %v598_v55  ;;  %2592 = vmatmul.mubr.bf16.gmra.mrb[44].mxu1 %v912_v45  ;;  %v859_v8 = vmax.f32 %v595_v43, %v795_v53  ;;  %v723_v35 = vadd.f32 %v2549_v32, %v3200_v42  ;;  %v714_v36 = vpop.f32.mrb[17].mxu1  ;;  %v3276_v37 = vpack.c.bf16 %v888_v26, %v887_v15 }
 0x10d   : > { %v794_v4 = vmul.f32 0.2, %v590_v60  ;;  %v857_v12 = vmax.f32 %v587_v48, %v793_v59  ;;  %v715_v39 = vadd.f32 %v3200_v42, %v714_v36  ;;  %v2550_v40 = vpop.f32.mrb[18].mxu1  ;;  %v3279_v41 = vpack.c.bf16 %v886_v31, %v885_v20 }
 0x10e   : > { %v860_v9 = vmax.f32 %v598_v55, %v796_v0  ;;  %v827_v44 = vmul.f32 0.2, %v723_v35  ;;  %v726_v45 = vadd.f32 %v2550_v40, %v3200_v42  ;;  %v717_v46 = vpop.f32.mrb[19].mxu1 }
 0x10f   : > { %v858_v13 = vmax.f32 %v590_v60, %v794_v4  ;;  %v2521_v14 = vpop.f32.mrb[20].mxu0  ;;  %v825_v49 = vmul.f32 0.2, %v715_v39  ;;  %v718_v51 = vadd.f32 %v3200_v42, %v717_v46 }
 0x110   : > { %v611_v17 = vadd.f32 %v2521_v14, %v3200_v42  ;;  %v602_v18 = vpop.f32.mrb[21].mxu0  ;;  %v914_v19 = vpack.c.bf16 %v860_v9, %v859_v8  ;;  %v891_v56 = vmax.f32 %v723_v35, %v827_v44  ;;  %v828_v57 = vmul.f32 0.2, %v726_v45 }
 0x111   : > { %v603_v22 = vadd.f32 %v3200_v42, %v602_v18  ;;  %v2522_v23 = vpop.f32.mrb[22].mxu0  ;;  %v913_v25 = vpack.c.bf16 %v858_v13, %v857_v12  ;;  %v889_v61 = vmax.f32 %v715_v39, %v825_v49  ;;  %v826_v62 = vmul.f32 0.2, %v718_v51 }
 0x112   : > { %v799_v27 = vmul.f32 0.2, %v611_v17  ;;  %v614_v29 = vadd.f32 %v2522_v23, %v3200_v42  ;;  %v605_v30 = vpop.f32.mrb[23].mxu0  ;;  %v892_v4 = vmax.f32 %v726_v45, %v828_v57 }
 0x113   : > { %v797_v33 = vmul.f32 0.2, %v603_v22  ;;  %v606_v34 = vadd.f32 %v3200_v42, %v605_v30  ;;  %2595 = vmatprep.mubr.bf16.mxu1 %v913_v25  ;;  %v890_v8 = vmax.f32 %v718_v51, %v826_v62  ;;  %v2553_v9 = vpop.f32.mrb[20].mxu1 }
 0x114   : > { %v800_v38 = vmul.f32 0.2, %v614_v29  ;;  %2596 = vmatmul.mubr.bf16.gmra.mrb[48].mxu1 %v914_v19  ;;  %v863_v47 = vmax.f32 %v611_v17, %v799_v27  ;;  %v739_v12 = vadd.f32 %v2553_v9, %v3200_v42  ;;  %v730_v13 = vpop.f32.mrb[21].mxu1  ;;  %v3288_v14 = vpack.c.bf16 %v892_v4, %v891_v56 }
 0x115   : > { %v798_v43 = vmul.f32 0.2, %v606_v34  ;;  %v861_v52 = vmax.f32 %v603_v22, %v797_v33  ;;  %v731_v16 = vadd.f32 %v3200_v42, %v730_v13  ;;  %v2554_v17 = vpop.f32.mrb[22].mxu1  ;;  %v3291_v18 = vpack.c.bf16 %v890_v8, %v889_v61 }
 0x116   : > { %v864_v48 = vmax.f32 %v614_v29, %v800_v38  ;;  %v831_v20 = vmul.f32 0.2, %v739_v12  ;;  %v742_v21 = vadd.f32 %v2554_v17, %v3200_v42  ;;  %v733_v22 = vpop.f32.mrb[23].mxu1 }
 0x117   : > { %v862_v53 = vmax.f32 %v606_v34, %v798_v43  ;;  %v2525_v55 = vpop.f32.mrb[24].mxu0  ;;  %v829_v26 = vmul.f32 0.2, %v731_v16  ;;  %v734_v27 = vadd.f32 %v3200_v42, %v733_v22 }
 0x118   : > { %v627_v58 = vadd.f32 %v2525_v55, %v3200_v42  ;;  %v618_v59 = vpop.f32.mrb[25].mxu0  ;;  %v916_v60 = vpack.c.bf16 %v864_v48, %v863_v47  ;;  %v895_v32 = vmax.f32 %v739_v12, %v831_v20  ;;  %v832_v33 = vmul.f32 0.2, %v742_v21 }
 0x119   : > { %v619_v0 = vadd.f32 %v3200_v42, %v618_v59  ;;  %v2526_v1 = vpop.f32.mrb[26].mxu0  ;;  %v915_v2 = vpack.c.bf16 %v862_v53, %v861_v52  ;;  %v893_v38 = vmax.f32 %v731_v16, %v829_v26  ;;  %v830_v39 = vmul.f32 0.2, %v734_v27 }
 0x11a   : > { %v803_v5 = vmul.f32 0.2, %v627_v58  ;;  %v630_v6 = vadd.f32 %v2526_v1, %v3200_v42  ;;  %v621_v7 = vpop.f32.mrb[27].mxu0  ;;  %v896_v45 = vmax.f32 %v742_v21, %v832_v33 }
 0x11b   : > { %v801_v10 = vmul.f32 0.2, %v619_v0  ;;  %v622_v11 = vadd.f32 %v3200_v42, %v621_v7  ;;  %2599 = vmatprep.mubr.bf16.mxu1 %v915_v2  ;;  %v894_v49 = vmax.f32 %v734_v27, %v830_v39  ;;  %v2557_v51 = vpop.f32.mrb[24].mxu1 }
 0x11c   : > { %v804_v15 = vmul.f32 0.2, %v630_v6  ;;  %2600 = vmatmul.mubr.bf16.gmra.mrb[52].mxu1 %v916_v60  ;;  %v867_v23 = vmax.f32 %v627_v58, %v803_v5  ;;  %v755_v55 = vadd.f32 %v2557_v51, %v3200_v42  ;;  %v746_v56 = vpop.f32.mrb[25].mxu1  ;;  %v932_v57 = vpack.c.bf16 %v896_v45, %v895_v32 }
 0x11d   : > { %v802_v19 = vmul.f32 0.2, %v622_v11  ;;  %v865_v29 = vmax.f32 %v619_v0, %v801_v10  ;;  %v747_v59 = vadd.f32 %v3200_v42, %v746_v56  ;;  %v2558_v60 = vpop.f32.mrb[26].mxu1  ;;  %v931_v61 = vpack.c.bf16 %v894_v49, %v893_v38 }
 0x11e   : > { %v868_v25 = vmax.f32 %v630_v6, %v804_v15  ;;  %v835_v0 = vmul.f32 0.2, %v755_v55  ;;  %v758_v1 = vadd.f32 %v2558_v60, %v3200_v42  ;;  %v749_v2 = vpop.f32.mrb[27].mxu1 }
 0x11f   : > { %v866_v30 = vmax.f32 %v622_v11, %v802_v19  ;;  %v2529_v31 = vpop.f32.mrb[28].mxu0  ;;  %v833_v6 = vmul.f32 0.2, %v747_v59  ;;  %v750_v7 = vadd.f32 %v3200_v42, %v749_v2 }
 0x120   : > { %v643_v34 = vadd.f32 %v2529_v31, %v3200_v42  ;;  %v634_v35 = vpop.f32.mrb[29].mxu0  ;;  %v918_v36 = vpack.c.bf16 %v868_v25, %v867_v23  ;;  %v899_v10 = vmax.f32 %v755_v55, %v835_v0  ;;  %v836_v11 = vmul.f32 0.2, %v758_v1 }
 0x121   : > { %v635_v40 = vadd.f32 %v3200_v42, %v634_v35  ;;  %v2530_v43 = vpop.f32.mrb[30].mxu0  ;;  %v917_v44 = vpack.c.bf16 %v866_v30, %v865_v29  ;;  %v897_v13 = vmax.f32 %v747_v59, %v833_v6  ;;  %v834_v15 = vmul.f32 0.2, %v750_v7 }
 0x122   : > { %v807_v46 = vmul.f32 0.2, %v643_v34  ;;  %v646_v47 = vadd.f32 %v2530_v43, %v3200_v42  ;;  %v637_v48 = vpop.f32.mrb[31].mxu0  ;;  %v900_v17 = vmax.f32 %v758_v1, %v836_v11 }
 0x123   : > { %v805_v52 = vmul.f32 0.2, %v635_v40  ;;  %v638_v53 = vadd.f32 %v3200_v42, %v637_v48  ;;  %2603 = vmatprep.mubr.bf16.mxu1 %v917_v44  ;;  %v898_v19 = vmax.f32 %v750_v7, %v834_v15  ;;  %v2561_v20 = vpop.f32.mrb[28].mxu1 }
 0x124   : > { %v808_v58 = vmul.f32 0.2, %v646_v47  ;;  %2604 = vmatmul.mubr.bf16.gmra.mrb[56].mxu1 %v918_v36  ;;  %v871_v4 = vmax.f32 %v643_v34, %v807_v46  ;;  %v771_v21 = vadd.f32 %v2561_v20, %v3200_v42  ;;  %v762_v22 = vpop.f32.mrb[29].mxu1  ;;  %v934_v23 = vpack.c.bf16 %v900_v17, %v899_v10 }
 0x125   : > { %v806_v62 = vmul.f32 0.2, %v638_v53  ;;  %v869_v8 = vmax.f32 %v635_v40, %v805_v52  ;;  %v763_v25 = vadd.f32 %v3200_v42, %v762_v22  ;;  %v2562_v26 = vpop.f32.mrb[30].mxu1  ;;  %v933_v27 = vpack.c.bf16 %v898_v19, %v897_v13 }
 0x126   : > { %v872_v5 = vmax.f32 %v646_v47, %v808_v58  ;;  %v839_v29 = vmul.f32 0.2, %v771_v21  ;;  %v774_v30 = vadd.f32 %v2562_v26, %v3200_v42  ;;  %v765_v31 = vpop.f32.mrb[31].mxu1 }
 0x127   : > { %v870_v9 = vmax.f32 %v638_v53, %v806_v62  ;;  %v837_v32 = vmul.f32 0.2, %v763_v25  ;;  %v766_v33 = vadd.f32 %v3200_v42, %v765_v31  ;;  %v2750_v42 = vld [vmem:[%s3598_s5 + $0x38] sm:$0xff]  }
 0x128   : > { %v920_v12 = vpack.c.bf16 %v872_v5, %v871_v4  ;;  %v903_v34 = vmax.f32 %v771_v21, %v839_v29  ;;  %v840_v35 = vmul.f32 0.2, %v774_v30  ;;  %2657 = vmatprep.subr.bf16.mxu0 %v2750_v42 }
 0x129   : > { %v919_v16 = vpack.c.bf16 %v870_v9, %v869_v8  ;;  %v901_v36 = vmax.f32 %v763_v25, %v837_v32  ;;  %v838_v38 = vmul.f32 0.2, %v766_v33  ;;  %2658 = vmatpush3.bf16.msra.mxu0 %v2750_v42 }
 0x12a   : > { %v904_v39 = vmax.f32 %v774_v30, %v840_v35 }
 0x12b   : > { %2607 = vmatprep.mubr.bf16.mxu1 %v919_v16  ;;  %v902_v40 = vmax.f32 %v766_v33, %v838_v38 }
 0x12c   : > { %2608 = vmatmul.mubr.bf16.gmra.mrb[60].mxu1 %v920_v12  ;;  %v936_v43 = vpack.c.bf16 %v904_v39, %v903_v34 }
 0x12d   : > { %2611 = vmatprep.mubr.bf16.mxu1 %v3237_v54  ;;  %v935_v44 = vpack.c.bf16 %v902_v40, %v901_v36 }
 0x134   : > { %2612 = vmatmul.mubr.bf16.gmra.mrb[64].mxu1 %v3234_v50  ;;  %v3323_v50 = vld [vmem:[%s3597_s4] ss:$0 sm:$0xff] }
 0x135   : > { %2615 = vmatprep.mubr.bf16.mxu1 %v3255_v28 }
 0x13c   : > { %2616 = vmatmul.mubr.bf16.gmra.mrb[68].mxu1 %v3252_v24 }
 0x13d   : > { %2619 = vmatprep.mubr.bf16.mxu1 %v3267_v3 }
 0x144   : > { %2620 = vmatmul.mubr.bf16.gmra.mrb[72].mxu1 %v3264_v63 }
 0x145   : > { %2623 = vmatprep.mubr.bf16.mxu1 %v3279_v41 }
 0x14c   : > { %2624 = vmatmul.mubr.bf16.gmra.mrb[76].mxu1 %v3276_v37 }
 0x14d   : > { %2627 = vmatprep.mubr.bf16.mxu1 %v3291_v18 }
 0x154   : > { %2628 = vmatmul.mubr.bf16.gmra.mrb[80].mxu1 %v3288_v14 }
 0x155   : > { %2631 = vmatprep.mubr.bf16.mxu1 %v931_v61 }
 0x15c   : > { %2632 = vmatmul.mubr.bf16.gmra.mrb[84].mxu1 %v932_v57 }
 0x15d   : > { %2635 = vmatprep.mubr.bf16.mxu1 %v933_v27 }
 0x164   : > { %2636 = vmatmul.mubr.bf16.gmra.mrb[88].mxu1 %v934_v23 }
 0x165   : > { %2639 = vmatprep.mubr.bf16.mxu1 %v935_v44 }
 0x16c   : > { %2640 = vmatmul.mubr.bf16.gmra.mrb[92].mxu1 %v936_v43 }
 0x1c7   : > { %v2581_v54 = vpop.f32.mrb[32].mxu1 }
 0x1c8   : > { %v1051_v24 = vadd.f32 %v2581_v54, %v3323_v50  ;;  %v1042_v28 = vpop.f32.mrb[33].mxu1 }
 0x1c9   : > { %v1043_v63 = vadd.f32 %v3323_v50, %v1042_v28  ;;  %v2582_v3 = vpop.f32.mrb[34].mxu1 }
 0x1ca   : > { %v1299_v37 = vmul.f32 0.2, %v1051_v24  ;;  %v1054_v41 = vadd.f32 %v2582_v3, %v3323_v50  ;;  %v1045_v14 = vpop.f32.mrb[35].mxu1 }
 0x1cb   : > { %v1297_v18 = vmul.f32 0.2, %v1043_v63  ;;  %v1046_v45 = vadd.f32 %v3323_v50, %v1045_v14 }
 0x1cc   : > { %v1300_v46 = vmul.f32 0.2, %v1054_v41  ;;  %v1363_v48 = vmax.f32 %v1051_v24, %v1299_v37 }
 0x1cd   : > { %v1298_v47 = vmul.f32 0.2, %v1046_v45  ;;  %v1361_v51 = vmax.f32 %v1043_v63, %v1297_v18 }
 0x1ce   : > { %v1364_v49 = vmax.f32 %v1054_v41, %v1300_v46 }
 0x1cf   : > { %v1362_v52 = vmax.f32 %v1046_v45, %v1298_v47  ;;  %v2585_v53 = vpop.f32.mrb[36].mxu1 }
 0x1d0   : > { %v1426_v55 = vpack.c.bf16 %v1364_v49, %v1363_v48  ;;  %v1067_v56 = vadd.f32 %v2585_v53, %v3323_v50  ;;  %v1058_v57 = vpop.f32.mrb[37].mxu1 }
 0x1d1   : > { %v1059_v58 = vadd.f32 %v3323_v50, %v1058_v57  ;;  %v2586_v59 = vpop.f32.mrb[38].mxu1  ;;  %v1425_v60 = vpack.c.bf16 %v1362_v52, %v1361_v51 }
 0x1d2   : > { %v1303_v61 = vmul.f32 0.2, %v1067_v56  ;;  %v1070_v62 = vadd.f32 %v2586_v59, %v3323_v50  ;;  %v1061_v0 = vpop.f32.mrb[39].mxu1 }
 0x1d3   : > { %v1301_v1 = vmul.f32 0.2, %v1059_v58  ;;  %v1062_v2 = vadd.f32 %v3323_v50, %v1061_v0  ;;  %2659 = vmatprep.mubr.bf16.mxu0 %v1425_v60 }
 0x1d4   : > { %v1304_v4 = vmul.f32 0.2, %v1070_v62  ;;  %2660 = vmatmul.mubr.bf16.vlgmr.msra.gmra.mrb[32].mxu0 %v1426_v55  ;;  %v1367_v6 = vmax.f32 %v1067_v56, %v1303_v61 }
 0x1d5   : > { %v1302_v5 = vmul.f32 0.2, %v1062_v2  ;;  %v1365_v8 = vmax.f32 %v1059_v58, %v1301_v1 }
 0x1d6   : > { %v1368_v7 = vmax.f32 %v1070_v62, %v1304_v4 }
 0x1d7   : > { %v1366_v9 = vmax.f32 %v1062_v2, %v1302_v5  ;;  %v2589_v10 = vpop.f32.mrb[40].mxu1 }
 0x1d8   : > { %v1083_v11 = vadd.f32 %v2589_v10, %v3323_v50  ;;  %v1074_v12 = vpop.f32.mrb[41].mxu1  ;;  %v1428_v13 = vpack.c.bf16 %v1368_v7, %v1367_v6 }
 0x1d9   : > { %v1075_v15 = vadd.f32 %v3323_v50, %v1074_v12  ;;  %v2590_v16 = vpop.f32.mrb[42].mxu1  ;;  %v1427_v17 = vpack.c.bf16 %v1366_v9, %v1365_v8 }
 0x1da   : > { %v1307_v19 = vmul.f32 0.2, %v1083_v11  ;;  %v1086_v20 = vadd.f32 %v2590_v16, %v3323_v50  ;;  %v1077_v21 = vpop.f32.mrb[43].mxu1 }
 0x1db   : > { %v1305_v22 = vmul.f32 0.2, %v1075_v15  ;;  %v1078_v23 = vadd.f32 %v3323_v50, %v1077_v21  ;;  %2663 = vmatprep.mubr.bf16.mxu0 %v1427_v17 }
 0x1dc   : > { %v1308_v25 = vmul.f32 0.2, %v1086_v20  ;;  %2664 = vmatmul.mubr.bf16.gmra.mrb[36].mxu0 %v1428_v13  ;;  %v1371_v27 = vmax.f32 %v1083_v11, %v1307_v19 }
 0x1dd   : > { %v1306_v26 = vmul.f32 0.2, %v1078_v23  ;;  %v1369_v30 = vmax.f32 %v1075_v15, %v1305_v22 }
 0x1de   : > { %v1372_v29 = vmax.f32 %v1086_v20, %v1308_v25 }
 0x1df   : > { %v1370_v31 = vmax.f32 %v1078_v23, %v1306_v26  ;;  %v2593_v32 = vpop.f32.mrb[44].mxu1 }
 0x1e0   : > { %v1099_v33 = vadd.f32 %v2593_v32, %v3323_v50  ;;  %v1090_v34 = vpop.f32.mrb[45].mxu1  ;;  %v1430_v35 = vpack.c.bf16 %v1372_v29, %v1371_v27 }
 0x1e1   : > { %v1091_v36 = vadd.f32 %v3323_v50, %v1090_v34  ;;  %v2594_v38 = vpop.f32.mrb[46].mxu1  ;;  %v1429_v39 = vpack.c.bf16 %v1370_v31, %v1369_v30 }
 0x1e2   : > { %v1311_v40 = vmul.f32 0.2, %v1099_v33  ;;  %v1102_v43 = vadd.f32 %v2594_v38, %v3323_v50  ;;  %v1093_v44 = vpop.f32.mrb[47].mxu1 }
 0x1e3   : > { %v1309_v42 = vmul.f32 0.2, %v1091_v36  ;;  %v1094_v54 = vadd.f32 %v3323_v50, %v1093_v44  ;;  %2667 = vmatprep.mubr.bf16.mxu0 %v1429_v39 }
 0x1e4   : > { %v1312_v24 = vmul.f32 0.2, %v1102_v43  ;;  %2668 = vmatmul.mubr.bf16.gmra.mrb[40].mxu0 %v1430_v35  ;;  %v1375_v63 = vmax.f32 %v1099_v33, %v1311_v40 }
 0x1e5   : > { %v1310_v28 = vmul.f32 0.2, %v1094_v54  ;;  %v1373_v37 = vmax.f32 %v1091_v36, %v1309_v42 }
 0x1e6   : > { %v1376_v3 = vmax.f32 %v1102_v43, %v1312_v24 }
 0x1e7   : > { %v1374_v41 = vmax.f32 %v1094_v54, %v1310_v28  ;;  %v2597_v14 = vpop.f32.mrb[48].mxu1 }
 0x1e8   : > { %v1115_v18 = vadd.f32 %v2597_v14, %v3323_v50  ;;  %v1106_v45 = vpop.f32.mrb[49].mxu1  ;;  %v1432_v46 = vpack.c.bf16 %v1376_v3, %v1375_v63 }
 0x1e9   : > { %v1107_v47 = vadd.f32 %v3323_v50, %v1106_v45  ;;  %v2598_v48 = vpop.f32.mrb[50].mxu1  ;;  %v1431_v49 = vpack.c.bf16 %v1374_v41, %v1373_v37 }
 0x1ea   : > { %v1315_v51 = vmul.f32 0.2, %v1115_v18  ;;  %v1118_v52 = vadd.f32 %v2598_v48, %v3323_v50  ;;  %v1109_v53 = vpop.f32.mrb[51].mxu1 }
 0x1eb   : > { %v1313_v55 = vmul.f32 0.2, %v1107_v47  ;;  %v1110_v56 = vadd.f32 %v3323_v50, %v1109_v53  ;;  %2671 = vmatprep.mubr.bf16.mxu0 %v1431_v49 }
 0x1ec   : > { %v1316_v57 = vmul.f32 0.2, %v1118_v52  ;;  %2672 = vmatmul.mubr.bf16.gmra.mrb[44].mxu0 %v1432_v46  ;;  %v1379_v59 = vmax.f32 %v1115_v18, %v1315_v51 }
 0x1ed   : > { %v1314_v58 = vmul.f32 0.2, %v1110_v56  ;;  %v1377_v61 = vmax.f32 %v1107_v47, %v1313_v55 }
 0x1ee   : > { %v1380_v60 = vmax.f32 %v1118_v52, %v1316_v57 }
 0x1ef   : > { %v1378_v62 = vmax.f32 %v1110_v56, %v1314_v58  ;;  %v2601_v0 = vpop.f32.mrb[52].mxu1 }
 0x1f0   : > { %v1131_v1 = vadd.f32 %v2601_v0, %v3323_v50  ;;  %v1122_v2 = vpop.f32.mrb[53].mxu1  ;;  %v1434_v4 = vpack.c.bf16 %v1380_v60, %v1379_v59 }
 0x1f1   : > { %v1123_v5 = vadd.f32 %v3323_v50, %v1122_v2  ;;  %v2602_v6 = vpop.f32.mrb[54].mxu1  ;;  %v1433_v7 = vpack.c.bf16 %v1378_v62, %v1377_v61 }
 0x1f2   : > { %v1319_v8 = vmul.f32 0.2, %v1131_v1  ;;  %v1134_v9 = vadd.f32 %v2602_v6, %v3323_v50  ;;  %v1125_v10 = vpop.f32.mrb[55].mxu1 }
 0x1f3   : > { %v1317_v11 = vmul.f32 0.2, %v1123_v5  ;;  %v1126_v12 = vadd.f32 %v3323_v50, %v1125_v10  ;;  %2675 = vmatprep.mubr.bf16.mxu0 %v1433_v7 }
 0x1f4   : > { %v1320_v13 = vmul.f32 0.2, %v1134_v9  ;;  %2676 = vmatmul.mubr.bf16.gmra.mrb[48].mxu0 %v1434_v4  ;;  %v1383_v16 = vmax.f32 %v1131_v1, %v1319_v8 }
 0x1f5   : > { %v1318_v15 = vmul.f32 0.2, %v1126_v12  ;;  %v1381_v19 = vmax.f32 %v1123_v5, %v1317_v11 }
 0x1f6   : > { %v1384_v17 = vmax.f32 %v1134_v9, %v1320_v13 }
 0x1f7   : > { %v1382_v20 = vmax.f32 %v1126_v12, %v1318_v15  ;;  %v2605_v21 = vpop.f32.mrb[56].mxu1 }
 0x1f8   : > { %v1147_v22 = vadd.f32 %v2605_v21, %v3323_v50  ;;  %v1138_v23 = vpop.f32.mrb[57].mxu1  ;;  %v1436_v25 = vpack.c.bf16 %v1384_v17, %v1383_v16 }
 0x1f9   : > { %v1139_v26 = vadd.f32 %v3323_v50, %v1138_v23  ;;  %v2606_v27 = vpop.f32.mrb[58].mxu1  ;;  %v1435_v29 = vpack.c.bf16 %v1382_v20, %v1381_v19 }
 0x1fa   : > { %v1323_v30 = vmul.f32 0.2, %v1147_v22  ;;  %v1150_v31 = vadd.f32 %v2606_v27, %v3323_v50  ;;  %v1141_v32 = vpop.f32.mrb[59].mxu1 }
 0x1fb   : > { %v1321_v33 = vmul.f32 0.2, %v1139_v26  ;;  %v1142_v34 = vadd.f32 %v3323_v50, %v1141_v32  ;;  %2679 = vmatprep.mubr.bf16.mxu0 %v1435_v29 }
 0x1fc   : > { %v1324_v35 = vmul.f32 0.2, %v1150_v31  ;;  %2680 = vmatmul.mubr.bf16.gmra.mrb[52].mxu0 %v1436_v25  ;;  %v1387_v38 = vmax.f32 %v1147_v22, %v1323_v30 }
 0x1fd   : > { %v1322_v36 = vmul.f32 0.2, %v1142_v34  ;;  %v1385_v40 = vmax.f32 %v1139_v26, %v1321_v33 }
 0x1fe   : > { %v1388_v39 = vmax.f32 %v1150_v31, %v1324_v35 }
 0x1ff   : > { %v1386_v43 = vmax.f32 %v1142_v34, %v1322_v36  ;;  %v2609_v44 = vpop.f32.mrb[60].mxu1 }
 0x200   : > { %v1163_v42 = vadd.f32 %v2609_v44, %v3323_v50  ;;  %v1154_v54 = vpop.f32.mrb[61].mxu1  ;;  %v1438_v24 = vpack.c.bf16 %v1388_v39, %v1387_v38 }
 0x201   : > { %v1155_v28 = vadd.f32 %v3323_v50, %v1154_v54  ;;  %v2610_v63 = vpop.f32.mrb[62].mxu1  ;;  %v1437_v3 = vpack.c.bf16 %v1386_v43, %v1385_v40 }
 0x202   : > { %v1327_v37 = vmul.f32 0.2, %v1163_v42  ;;  %v1166_v41 = vadd.f32 %v2610_v63, %v3323_v50  ;;  %v1157_v14 = vpop.f32.mrb[63].mxu1 }
 0x203   : > { %v1325_v18 = vmul.f32 0.2, %v1155_v28  ;;  %v1158_v45 = vadd.f32 %v3323_v50, %v1157_v14  ;;  %2683 = vmatprep.mubr.bf16.mxu0 %v1437_v3 }
 0x204   : > { %v1328_v46 = vmul.f32 0.2, %v1166_v41  ;;  %2684 = vmatmul.mubr.bf16.gmra.mrb[56].mxu0 %v1438_v24  ;;  %v1391_v48 = vmax.f32 %v1163_v42, %v1327_v37 }
 0x205   : > { %v1326_v47 = vmul.f32 0.2, %v1158_v45  ;;  %v1389_v51 = vmax.f32 %v1155_v28, %v1325_v18 }
 0x206   : > { %v1392_v49 = vmax.f32 %v1166_v41, %v1328_v46 }
 0x207   : > { %v1390_v52 = vmax.f32 %v1158_v45, %v1326_v47  ;;  %v2613_v53 = vpop.f32.mrb[64].mxu1 }
 0x208   : > { %v1179_v55 = vadd.f32 %v2613_v53, %v3323_v50  ;;  %v1170_v56 = vpop.f32.mrb[65].mxu1  ;;  %v1440_v57 = vpack.c.bf16 %v1392_v49, %v1391_v48 }
 0x209   : > { %v1171_v58 = vadd.f32 %v3323_v50, %v1170_v56  ;;  %v2614_v59 = vpop.f32.mrb[66].mxu1  ;;  %v1439_v60 = vpack.c.bf16 %v1390_v52, %v1389_v51 }
 0x20a   : > { %v1331_v61 = vmul.f32 0.2, %v1179_v55  ;;  %v1182_v62 = vadd.f32 %v2614_v59, %v3323_v50  ;;  %v1173_v0 = vpop.f32.mrb[67].mxu1 }
 0x20b   : > { %v1329_v1 = vmul.f32 0.2, %v1171_v58  ;;  %v1174_v2 = vadd.f32 %v3323_v50, %v1173_v0  ;;  %2687 = vmatprep.mubr.bf16.mxu0 %v1439_v60 }
 0x20c   : > { %v1332_v4 = vmul.f32 0.2, %v1182_v62  ;;  %2688 = vmatmul.mubr.bf16.gmra.mrb[60].mxu0 %v1440_v57  ;;  %v1395_v6 = vmax.f32 %v1179_v55, %v1331_v61 }
 0x20d   : > { %v1330_v5 = vmul.f32 0.2, %v1174_v2  ;;  %v1393_v8 = vmax.f32 %v1171_v58, %v1329_v1 }
 0x20e   : > { %v1396_v7 = vmax.f32 %v1182_v62, %v1332_v4 }
 0x20f   : > { %v1394_v9 = vmax.f32 %v1174_v2, %v1330_v5  ;;  %v2617_v10 = vpop.f32.mrb[68].mxu1 }
 0x210   : > { %v1195_v11 = vadd.f32 %v2617_v10, %v3323_v50  ;;  %v1186_v12 = vpop.f32.mrb[69].mxu1  ;;  %v1442_v13 = vpack.c.bf16 %v1396_v7, %v1395_v6 }
 0x211   : > { %v1187_v15 = vadd.f32 %v3323_v50, %v1186_v12  ;;  %v2618_v16 = vpop.f32.mrb[70].mxu1  ;;  %v1441_v17 = vpack.c.bf16 %v1394_v9, %v1393_v8 }
 0x212   : > { %v1335_v19 = vmul.f32 0.2, %v1195_v11  ;;  %v1198_v20 = vadd.f32 %v2618_v16, %v3323_v50  ;;  %v1189_v21 = vpop.f32.mrb[71].mxu1 }
 0x213   : > { %v1333_v22 = vmul.f32 0.2, %v1187_v15  ;;  %v1190_v23 = vadd.f32 %v3323_v50, %v1189_v21  ;;  %2691 = vmatprep.mubr.bf16.mxu0 %v1441_v17 }
 0x214   : > { %v1336_v25 = vmul.f32 0.2, %v1198_v20  ;;  %2692 = vmatmul.mubr.bf16.gmra.mrb[64].mxu0 %v1442_v13  ;;  %v1399_v27 = vmax.f32 %v1195_v11, %v1335_v19 }
 0x215   : > { %v1334_v26 = vmul.f32 0.2, %v1190_v23  ;;  %v1397_v30 = vmax.f32 %v1187_v15, %v1333_v22 }
 0x216   : > { %v1400_v29 = vmax.f32 %v1198_v20, %v1336_v25 }
 0x217   : > { %v1398_v31 = vmax.f32 %v1190_v23, %v1334_v26  ;;  %v2621_v32 = vpop.f32.mrb[72].mxu1 }
 0x218   : > { %v1211_v33 = vadd.f32 %v2621_v32, %v3323_v50  ;;  %v1202_v34 = vpop.f32.mrb[73].mxu1  ;;  %v1444_v35 = vpack.c.bf16 %v1400_v29, %v1399_v27 }
 0x219   : > { %v1203_v36 = vadd.f32 %v3323_v50, %v1202_v34  ;;  %v2622_v38 = vpop.f32.mrb[74].mxu1  ;;  %v1443_v39 = vpack.c.bf16 %v1398_v31, %v1397_v30 }
 0x21a   : > { %v1339_v40 = vmul.f32 0.2, %v1211_v33  ;;  %v1214_v43 = vadd.f32 %v2622_v38, %v3323_v50  ;;  %v1205_v44 = vpop.f32.mrb[75].mxu1 }
 0x21b   : > { %v1337_v42 = vmul.f32 0.2, %v1203_v36  ;;  %v1206_v54 = vadd.f32 %v3323_v50, %v1205_v44  ;;  %2695 = vmatprep.mubr.bf16.mxu0 %v1443_v39 }
 0x21c   : > { %v1340_v24 = vmul.f32 0.2, %v1214_v43  ;;  %2696 = vmatmul.mubr.bf16.gmra.mrb[68].mxu0 %v1444_v35  ;;  %v1403_v63 = vmax.f32 %v1211_v33, %v1339_v40 }
 0x21d   : > { %v1338_v28 = vmul.f32 0.2, %v1206_v54  ;;  %v1401_v37 = vmax.f32 %v1203_v36, %v1337_v42 }
 0x21e   : > { %v1404_v3 = vmax.f32 %v1214_v43, %v1340_v24 }
 0x21f   : > { %v1402_v41 = vmax.f32 %v1206_v54, %v1338_v28  ;;  %v2625_v14 = vpop.f32.mrb[76].mxu1 }
 0x220   : > { %v1227_v18 = vadd.f32 %v2625_v14, %v3323_v50  ;;  %v1218_v45 = vpop.f32.mrb[77].mxu1  ;;  %v1446_v46 = vpack.c.bf16 %v1404_v3, %v1403_v63 }
 0x221   : > { %v1219_v47 = vadd.f32 %v3323_v50, %v1218_v45  ;;  %v2626_v48 = vpop.f32.mrb[78].mxu1  ;;  %v1445_v49 = vpack.c.bf16 %v1402_v41, %v1401_v37 }
 0x222   : > { %v1343_v51 = vmul.f32 0.2, %v1227_v18  ;;  %v1230_v52 = vadd.f32 %v2626_v48, %v3323_v50  ;;  %v1221_v53 = vpop.f32.mrb[79].mxu1 }
 0x223   : > { %v1341_v55 = vmul.f32 0.2, %v1219_v47  ;;  %v1222_v56 = vadd.f32 %v3323_v50, %v1221_v53  ;;  %2699 = vmatprep.mubr.bf16.mxu0 %v1445_v49 }
 0x224   : > { %v1344_v57 = vmul.f32 0.2, %v1230_v52  ;;  %2700 = vmatmul.mubr.bf16.gmra.mrb[72].mxu0 %v1446_v46  ;;  %v1407_v59 = vmax.f32 %v1227_v18, %v1343_v51 }
 0x225   : > { %v1342_v58 = vmul.f32 0.2, %v1222_v56  ;;  %v1405_v61 = vmax.f32 %v1219_v47, %v1341_v55 }
 0x226   : > { %v1408_v60 = vmax.f32 %v1230_v52, %v1344_v57 }
 0x227   : > { %v1406_v62 = vmax.f32 %v1222_v56, %v1342_v58  ;;  %v2629_v0 = vpop.f32.mrb[80].mxu1 }
 0x228   : > { %v1243_v1 = vadd.f32 %v2629_v0, %v3323_v50  ;;  %v1234_v2 = vpop.f32.mrb[81].mxu1  ;;  %v1448_v4 = vpack.c.bf16 %v1408_v60, %v1407_v59 }
 0x229   : > { %v1235_v5 = vadd.f32 %v3323_v50, %v1234_v2  ;;  %v2630_v6 = vpop.f32.mrb[82].mxu1  ;;  %v1447_v7 = vpack.c.bf16 %v1406_v62, %v1405_v61 }
 0x22a   : > { %v1347_v8 = vmul.f32 0.2, %v1243_v1  ;;  %v1246_v9 = vadd.f32 %v2630_v6, %v3323_v50  ;;  %v1237_v10 = vpop.f32.mrb[83].mxu1 }
 0x22b   : > { %v1345_v11 = vmul.f32 0.2, %v1235_v5  ;;  %v1238_v12 = vadd.f32 %v3323_v50, %v1237_v10  ;;  %2703 = vmatprep.mubr.bf16.mxu0 %v1447_v7 }
 0x22c   : > { %v1348_v13 = vmul.f32 0.2, %v1246_v9  ;;  %2704 = vmatmul.mubr.bf16.gmra.mrb[76].mxu0 %v1448_v4  ;;  %v1411_v16 = vmax.f32 %v1243_v1, %v1347_v8 }
 0x22d   : > { %v1346_v15 = vmul.f32 0.2, %v1238_v12  ;;  %v1409_v19 = vmax.f32 %v1235_v5, %v1345_v11 }
 0x22e   : > { %v1412_v17 = vmax.f32 %v1246_v9, %v1348_v13 }
 0x22f   : > { %v1410_v20 = vmax.f32 %v1238_v12, %v1346_v15  ;;  %v2633_v21 = vpop.f32.mrb[84].mxu1  ;;  %v3392_v12 = vld [vmem:[%s3599_s6] ss:$0 sm:$0xff] }
 0x230   : > { %v1259_v22 = vadd.f32 %v2633_v21, %v3323_v50  ;;  %v1250_v23 = vpop.f32.mrb[85].mxu1  ;;  %v1450_v25 = vpack.c.bf16 %v1412_v17, %v1411_v16 }
 0x231   : > { %v1251_v26 = vadd.f32 %v3323_v50, %v1250_v23  ;;  %v2634_v27 = vpop.f32.mrb[86].mxu1  ;;  %v1449_v29 = vpack.c.bf16 %v1410_v20, %v1409_v19 }
 0x232   : > { %v1351_v30 = vmul.f32 0.2, %v1259_v22  ;;  %v1262_v31 = vadd.f32 %v2634_v27, %v3323_v50  ;;  %v1253_v32 = vpop.f32.mrb[87].mxu1 }
 0x233   : > { %v1349_v33 = vmul.f32 0.2, %v1251_v26  ;;  %v1254_v34 = vadd.f32 %v3323_v50, %v1253_v32  ;;  %2707 = vmatprep.mubr.bf16.mxu0 %v1449_v29 }
 0x234   : > { %v1352_v35 = vmul.f32 0.2, %v1262_v31  ;;  %2708 = vmatmul.mubr.bf16.gmra.mrb[80].mxu0 %v1450_v25  ;;  %v1415_v38 = vmax.f32 %v1259_v22, %v1351_v30 }
 0x235   : > { %v1350_v36 = vmul.f32 0.2, %v1254_v34  ;;  %v1413_v40 = vmax.f32 %v1251_v26, %v1349_v33 }
 0x236   : > { %v1416_v39 = vmax.f32 %v1262_v31, %v1352_v35 }
 0x237   : > { %v1414_v43 = vmax.f32 %v1254_v34, %v1350_v36  ;;  %v2637_v44 = vpop.f32.mrb[88].mxu1 }
 0x238   : > { %v1275_v42 = vadd.f32 %v2637_v44, %v3323_v50  ;;  %v1266_v54 = vpop.f32.mrb[89].mxu1  ;;  %v1452_v24 = vpack.c.bf16 %v1416_v39, %v1415_v38 }
 0x239   : > { %v1267_v28 = vadd.f32 %v3323_v50, %v1266_v54  ;;  %v2638_v63 = vpop.f32.mrb[90].mxu1  ;;  %v1451_v3 = vpack.c.bf16 %v1414_v43, %v1413_v40 }
 0x23a   : > { %v1355_v37 = vmul.f32 0.2, %v1275_v42  ;;  %v1278_v41 = vadd.f32 %v2638_v63, %v3323_v50  ;;  %v1269_v14 = vpop.f32.mrb[91].mxu1 }
 0x23b   : > { %v1353_v18 = vmul.f32 0.2, %v1267_v28  ;;  %v1270_v45 = vadd.f32 %v3323_v50, %v1269_v14  ;;  %2711 = vmatprep.mubr.bf16.mxu0 %v1451_v3 }
 0x23c   : > { %v1356_v46 = vmul.f32 0.2, %v1278_v41  ;;  %2712 = vmatmul.mubr.bf16.gmra.mrb[84].mxu0 %v1452_v24  ;;  %v1419_v48 = vmax.f32 %v1275_v42, %v1355_v37 }
 0x23d   : > { %v1354_v47 = vmul.f32 0.2, %v1270_v45  ;;  %v1417_v51 = vmax.f32 %v1267_v28, %v1353_v18 }
 0x23e   : > { %v1420_v49 = vmax.f32 %v1278_v41, %v1356_v46 }
 0x23f   : > { %v1418_v52 = vmax.f32 %v1270_v45, %v1354_v47  ;;  %v2641_v53 = vpop.f32.mrb[92].mxu1 }
 0x240   : > { %v1291_v55 = vadd.f32 %v2641_v53, %v3323_v50  ;;  %v1282_v56 = vpop.f32.mrb[93].mxu1  ;;  %v1454_v57 = vpack.c.bf16 %v1420_v49, %v1419_v48 }
 0x241   : > { %v1283_v58 = vadd.f32 %v3323_v50, %v1282_v56  ;;  %v2642_v59 = vpop.f32.mrb[94].mxu1  ;;  %v1453_v60 = vpack.c.bf16 %v1418_v52, %v1417_v51 }
 0x242   : > { %v1359_v61 = vmul.f32 0.2, %v1291_v55  ;;  %v1294_v62 = vadd.f32 %v2642_v59, %v3323_v50  ;;  %v1285_v0 = vpop.f32.mrb[95].mxu1 }
 0x243   : > { %v1357_v1 = vmul.f32 0.2, %v1283_v58  ;;  %v1286_v2 = vadd.f32 %v3323_v50, %v1285_v0  ;;  %2715 = vmatprep.mubr.bf16.mxu0 %v1453_v60 }
 0x244   : > { %v1360_v4 = vmul.f32 0.2, %v1294_v62  ;;  %2716 = vmatmul.mubr.bf16.gmra.mrb[88].mxu0 %v1454_v57  ;;  %v1423_v6 = vmax.f32 %v1291_v55, %v1359_v61 }
 0x245   : > { %v1358_v5 = vmul.f32 0.2, %v1286_v2  ;;  %v1421_v8 = vmax.f32 %v1283_v58, %v1357_v1 }
 0x246   : > { %v1424_v7 = vmax.f32 %v1294_v62, %v1360_v4 }
 0x247   : > { %v1422_v9 = vmax.f32 %v1286_v2, %v1358_v5 }
 0x248   : > { %v1456_v10 = vpack.c.bf16 %v1424_v7, %v1423_v6 }
 0x249   : > { %v1455_v11 = vpack.c.bf16 %v1422_v9, %v1421_v8 }
 0x24b   : > { %2719 = vmatprep.mubr.bf16.mxu0 %v1455_v11 }
 0x24c   : > { %2720 = vmatmul.mubr.bf16.gmra.mrb[92].mxu0 %v1456_v10 }
 0x2a7   : > { %v2661_v13 = vpop.f32.mrb[32].mxu0 }
 0x2a8   : > { %v1571_v50 = vadd.f32 %v2661_v13, %v3392_v12  ;;  %v1562_v15 = vpop.f32.mrb[33].mxu0 }
 0x2a9   : > { %v1563_v16 = vadd.f32 %v3392_v12, %v1562_v15  ;;  %v2662_v17 = vpop.f32.mrb[34].mxu0 }
 0x2aa   : > { %v1819_v19 = vsub.f32 0.0, %v1571_v50  ;;  %v1574_v20 = vadd.f32 %v2662_v17, %v3392_v12  ;;  %v1565_v21 = vpop.f32.mrb[35].mxu0 }
 0x2ab   : > { %v1817_v22 = vsub.f32 0.0, %v1563_v16  ;;  %v1566_v23 = vadd.f32 %v3392_v12, %v1565_v21 }
 0x2ac   : > { %v1885_v25 = vmul.f32 1.442695, %v1819_v19  ;;  %v1820_v26 = vsub.f32 0.0, %v1574_v20 }
 0x2ad   : > { %v1881_v27 = vmul.f32 1.442695, %v1817_v22  ;;  %v1818_v29 = vsub.f32 0.0, %v1566_v23 }
 0x2ae   : > { %2751 = vpow2.f32 %v1885_v25  ;;  %v1887_v30 = vmul.f32 1.442695, %v1820_v26 }
 0x2af   : > { %2753 = vpow2.f32 %v1881_v27  ;;  %v1883_v31 = vmul.f32 1.442695, %v1818_v29  ;;  %v2665_v32 = vpop.f32.mrb[36].mxu0 }
 0x2b0   : > { %2755 = vpow2.f32 %v1887_v30  ;;  %v1587_v33 = vadd.f32 %v2665_v32, %v3392_v12  ;;  %v1578_v34 = vpop.f32.mrb[37].mxu0 }
 0x2b1   : > { %2757 = vpow2.f32 %v1883_v31  ;;  %v1579_v35 = vadd.f32 %v3392_v12, %v1578_v34  ;;  %v2666_v36 = vpop.f32.mrb[38].mxu0 }
 0x2b2   : > { %v1823_v38 = vsub.f32 0.0, %v1587_v33  ;;  %v1590_v39 = vadd.f32 %v2666_v36, %v3392_v12  ;;  %v1581_v40 = vpop.f32.mrb[39].mxu0 }
 0x2b3   : > { %v1821_v43 = vsub.f32 0.0, %v1579_v35  ;;  %v1582_v44 = vadd.f32 %v3392_v12, %v1581_v40 }
 0x2b4   : > { %v1893_v42 = vmul.f32 1.442695, %v1823_v38  ;;  %v1824_v54 = vsub.f32 0.0, %v1590_v39 }
 0x2b5   : > { %v1889_v24 = vmul.f32 1.442695, %v1821_v43  ;;  %v1822_v28 = vsub.f32 0.0, %v1582_v44 }
 0x2b6   : > { %2759 = vpow2.f32 %v1893_v42  ;;  %v1895_v63 = vmul.f32 1.442695, %v1824_v54 }
 0x2b7   : > { %2761 = vpow2.f32 %v1889_v24  ;;  %v1891_v3 = vmul.f32 1.442695, %v1822_v28  ;;  %v2669_v37 = vpop.f32.mrb[40].mxu0 }
 0x2b8   : > { %v2752_v41 = vpop.eup %2751  ;;  %2763 = vpow2.f32 %v1895_v63  ;;  %v1603_v14 = vadd.f32 %v2669_v37, %v3392_v12  ;;  %v1594_v18 = vpop.f32.mrb[41].mxu0 }
 0x2b9   : > { %v2754_v45 = vpop.eup %2753  ;;  %v2011_v46 = vadd.f32 1.0, %v2752_v41  ;;  %2765 = vpow2.f32 %v1891_v3  ;;  %v1595_v47 = vadd.f32 %v3392_v12, %v1594_v18  ;;  %v2670_v48 = vpop.f32.mrb[42].mxu0 }
 0x2ba   : > { %v2756_v49 = vpop.eup %2755  ;;  %v2009_v51 = vadd.f32 1.0, %v2754_v45  ;;  %v1827_v52 = vsub.f32 0.0, %v1603_v14  ;;  %v1606_v53 = vadd.f32 %v2670_v48, %v3392_v12  ;;  %v1597_v55 = vpop.f32.mrb[43].mxu0 }
 0x2bb   : > { %v2758_v56 = vpop.eup %2757  ;;  %2767 = vrcp.f32 %v2011_v46  ;;  %v2012_v57 = vadd.f32 1.0, %v2756_v49  ;;  %v1825_v58 = vsub.f32 0.0, %v1595_v47  ;;  %v1598_v59 = vadd.f32 %v3392_v12, %v1597_v55 }
 0x2bc   : > { %2769 = vrcp.f32 %v2009_v51  ;;  %v2010_v60 = vadd.f32 1.0, %v2758_v56  ;;  %v1901_v61 = vmul.f32 1.442695, %v1827_v52  ;;  %v1828_v62 = vsub.f32 0.0, %v1606_v53 }
 0x2bd   : > { %2771 = vrcp.f32 %v2012_v57  ;;  %v1897_v0 = vmul.f32 1.442695, %v1825_v58  ;;  %v1826_v1 = vsub.f32 0.0, %v1598_v59 }
 0x2be   : > { %2773 = vrcp.f32 %v2010_v60  ;;  %v1903_v2 = vmul.f32 1.442695, %v1828_v62 }
 0x2bf   : > { %2775 = vpow2.f32 %v1901_v61  ;;  %v1899_v4 = vmul.f32 1.442695, %v1826_v1  ;;  %v2673_v5 = vpop.f32.mrb[44].mxu0 }
 0x2c0   : > { %v2760_v6 = vpop.eup %2759  ;;  %2777 = vpow2.f32 %v1897_v0  ;;  %v1619_v7 = vadd.f32 %v2673_v5, %v3392_v12  ;;  %v1610_v8 = vpop.f32.mrb[45].mxu0 }
 0x2c1   : > { %v2762_v9 = vpop.eup %2761  ;;  %v2015_v10 = vadd.f32 1.0, %v2760_v6  ;;  %2779 = vpow2.f32 %v1903_v2  ;;  %v1611_v11 = vadd.f32 %v3392_v12, %v1610_v8  ;;  %v2674_v13 = vpop.f32.mrb[46].mxu0 }
 0x2c2   : > { %v2764_v50 = vpop.eup %2763  ;;  %v2013_v15 = vadd.f32 1.0, %v2762_v9  ;;  %2781 = vpow2.f32 %v1899_v4  ;;  %v1831_v16 = vsub.f32 0.0, %v1619_v7  ;;  %v1622_v17 = vadd.f32 %v2674_v13, %v3392_v12  ;;  %v1613_v19 = vpop.f32.mrb[47].mxu0 }
 0x2c3   : > { %v2766_v20 = vpop.eup %2765  ;;  %2783 = vrcp.f32 %v2015_v10  ;;  %v2016_v21 = vadd.f32 1.0, %v2764_v50  ;;  %v1829_v22 = vsub.f32 0.0, %v1611_v11  ;;  %v1614_v23 = vadd.f32 %v3392_v12, %v1613_v19 }
 0x2c4   : > { %2785 = vrcp.f32 %v2013_v15  ;;  %v2014_v25 = vadd.f32 1.0, %v2766_v20  ;;  %v1909_v26 = vmul.f32 1.442695, %v1831_v16  ;;  %v1832_v27 = vsub.f32 0.0, %v1622_v17 }
 0x2c5   : > { %v2768_v29 = vpop.eup %2767  ;;  %2787 = vrcp.f32 %v2016_v21  ;;  %v1905_v30 = vmul.f32 1.442695, %v1829_v22  ;;  %v1830_v31 = vsub.f32 0.0, %v1614_v23 }
 0x2c6   : > { %v2770_v32 = vpop.eup %2769  ;;  %2204 = vst.msk [vmem:[%s3414_s10 + $0x10] sm:$0xff] %vm2201_vm2, %v2768_v29  ;;  %2789 = vrcp.f32 %v2014_v25  ;;  %v1911_v33 = vmul.f32 1.442695, %v1832_v27 }
 0x2c7   : > { %v2772_v34 = vpop.eup %2771  ;;  %2202 = vst.msk [vmem:[%s3414_s10] sm:$0xff] %vm2201_vm2, %v2770_v32  ;;  %2791 = vpow2.f32 %v1909_v26  ;;  %v1907_v35 = vmul.f32 1.442695, %v1830_v31  ;;  %v2677_v36 = vpop.f32.mrb[48].mxu0 }
 0x2c8   : > { %v2774_v38 = vpop.eup %2773  ;;  %2205 = vst.msk [vmem:[%s3414_s10 + $0x18] sm:$0xff] %vm2201_vm2, %v2772_v34  ;;  %2793 = vpow2.f32 %v1905_v30  ;;  %v1635_v39 = vadd.f32 %v2677_v36, %v3392_v12  ;;  %v1626_v40 = vpop.f32.mrb[49].mxu0 }
 0x2c9   : > { %v2776_v43 = vpop.eup %2775  ;;  %2203 = vst.msk [vmem:[%s3414_s10 + $0x8] sm:$0xff] %vm2201_vm2, %v2774_v38  ;;  %2795 = vpow2.f32 %v1911_v33  ;;  %v1627_v44 = vadd.f32 %v3392_v12, %v1626_v40  ;;  %v2678_v42 = vpop.f32.mrb[50].mxu0 }
 0x2ca   : > { %v2778_v54 = vpop.eup %2777  ;;  %v2019_v24 = vadd.f32 1.0, %v2776_v43  ;;  %2797 = vpow2.f32 %v1907_v35  ;;  %v1835_v28 = vsub.f32 0.0, %v1635_v39  ;;  %v1638_v63 = vadd.f32 %v2678_v42, %v3392_v12  ;;  %v1629_v3 = vpop.f32.mrb[51].mxu0 }
 0x2cb   : > { %v2780_v37 = vpop.eup %2779  ;;  %v2017_v41 = vadd.f32 1.0, %v2778_v54  ;;  %v1833_v14 = vsub.f32 0.0, %v1627_v44  ;;  %v1630_v18 = vadd.f32 %v3392_v12, %v1629_v3 }
 0x2cc   : > { %v2782_v45 = vpop.eup %2781  ;;  %2799 = vrcp.f32 %v2019_v24  ;;  %v2020_v46 = vadd.f32 1.0, %v2780_v37  ;;  %v1917_v47 = vmul.f32 1.442695, %v1835_v28  ;;  %v1836_v48 = vsub.f32 0.0, %v1638_v63 }
 0x2cd   : > { %v2784_v49 = vpop.eup %2783  ;;  %2801 = vrcp.f32 %v2017_v41  ;;  %v2018_v51 = vadd.f32 1.0, %v2782_v45  ;;  %v1913_v52 = vmul.f32 1.442695, %v1833_v14  ;;  %v1834_v53 = vsub.f32 0.0, %v1630_v18 }
 0x2ce   : > { %v2786_v55 = vpop.eup %2785  ;;  %2208 = vst.msk [vmem:[%s3414_s10 + $0x30] sm:$0xff] %vm2201_vm2, %v2784_v49  ;;  %2803 = vrcp.f32 %v2020_v46  ;;  %v1919_v56 = vmul.f32 1.442695, %v1836_v48 }
 0x2cf   : > { %v2788_v57 = vpop.eup %2787  ;;  %2206 = vst.msk [vmem:[%s3414_s10 + $0x20] sm:$0xff] %vm2201_vm2, %v2786_v55  ;;  %2805 = vrcp.f32 %v2018_v51  ;;  %v1915_v58 = vmul.f32 1.442695, %v1834_v53  ;;  %v2681_v59 = vpop.f32.mrb[52].mxu0 }
 0x2d0   : > { %v2790_v60 = vpop.eup %2789  ;;  %2209 = vst.msk [vmem:[%s3414_s10 + $0x38] sm:$0xff] %vm2201_vm2, %v2788_v57  ;;  %2807 = vpow2.f32 %v1917_v47  ;;  %v1651_v61 = vadd.f32 %v2681_v59, %v3392_v12  ;;  %v1642_v62 = vpop.f32.mrb[53].mxu0 }
 0x2d1   : > { %v2792_v0 = vpop.eup %2791  ;;  %2207 = vst.msk [vmem:[%s3414_s10 + $0x28] sm:$0xff] %vm2201_vm2, %v2790_v60  ;;  %2809 = vpow2.f32 %v1913_v52  ;;  %v1643_v1 = vadd.f32 %v3392_v12, %v1642_v62  ;;  %v2682_v2 = vpop.f32.mrb[54].mxu0 }
 0x2d2   : > { %v2794_v4 = vpop.eup %2793  ;;  %v2023_v5 = vadd.f32 1.0, %v2792_v0  ;;  %2811 = vpow2.f32 %v1919_v56  ;;  %v1839_v6 = vsub.f32 0.0, %v1651_v61  ;;  %v1654_v7 = vadd.f32 %v2682_v2, %v3392_v12  ;;  %v1645_v8 = vpop.f32.mrb[55].mxu0 }
 0x2d3   : > { %v2796_v9 = vpop.eup %2795  ;;  %v2021_v10 = vadd.f32 1.0, %v2794_v4  ;;  %2813 = vpow2.f32 %v1915_v58  ;;  %v1837_v11 = vsub.f32 0.0, %v1643_v1  ;;  %v1646_v13 = vadd.f32 %v3392_v12, %v1645_v8 }
 0x2d4   : > { %v2798_v50 = vpop.eup %2797  ;;  %2815 = vrcp.f32 %v2023_v5  ;;  %v2024_v15 = vadd.f32 1.0, %v2796_v9  ;;  %v1925_v16 = vmul.f32 1.442695, %v1839_v6  ;;  %v1840_v17 = vsub.f32 0.0, %v1654_v7 }
 0x2d5   : > { %2817 = vrcp.f32 %v2021_v10  ;;  %v2022_v19 = vadd.f32 1.0, %v2798_v50  ;;  %v1921_v20 = vmul.f32 1.442695, %v1837_v11  ;;  %v1838_v21 = vsub.f32 0.0, %v1646_v13 }
 0x2d6   : > { %v2800_v22 = vpop.eup %2799  ;;  %2819 = vrcp.f32 %v2024_v15  ;;  %v1927_v23 = vmul.f32 1.442695, %v1840_v17 }
 0x2d7   : > { %v2802_v25 = vpop.eup %2801  ;;  %2212 = vst.msk [vmem:[%s3414_s10 + $0x50] sm:$0xff] %vm2201_vm2, %v2800_v22  ;;  %2821 = vrcp.f32 %v2022_v19  ;;  %v1923_v26 = vmul.f32 1.442695, %v1838_v21  ;;  %v2685_v27 = vpop.f32.mrb[56].mxu0 }
 0x2d8   : > { %v2804_v29 = vpop.eup %2803  ;;  %2210 = vst.msk [vmem:[%s3414_s10 + $0x40] sm:$0xff] %vm2201_vm2, %v2802_v25  ;;  %2823 = vpow2.f32 %v1925_v16  ;;  %v1667_v30 = vadd.f32 %v2685_v27, %v3392_v12  ;;  %v1658_v31 = vpop.f32.mrb[57].mxu0 }
 0x2d9   : > { %v2806_v32 = vpop.eup %2805  ;;  %2213 = vst.msk [vmem:[%s3414_s10 + $0x58] sm:$0xff] %vm2201_vm2, %v2804_v29  ;;  %2825 = vpow2.f32 %v1921_v20  ;;  %v1659_v33 = vadd.f32 %v3392_v12, %v1658_v31  ;;  %v2686_v34 = vpop.f32.mrb[58].mxu0 }
 0x2da   : > { %v2808_v35 = vpop.eup %2807  ;;  %2211 = vst.msk [vmem:[%s3414_s10 + $0x48] sm:$0xff] %vm2201_vm2, %v2806_v32  ;;  %2827 = vpow2.f32 %v1927_v23  ;;  %v1843_v36 = vsub.f32 0.0, %v1667_v30  ;;  %v1670_v38 = vadd.f32 %v2686_v34, %v3392_v12  ;;  %v1661_v39 = vpop.f32.mrb[59].mxu0 }
 0x2db   : > { %v2810_v40 = vpop.eup %2809  ;;  %v2027_v43 = vadd.f32 1.0, %v2808_v35  ;;  %2829 = vpow2.f32 %v1923_v26  ;;  %v1841_v44 = vsub.f32 0.0, %v1659_v33  ;;  %v1662_v42 = vadd.f32 %v3392_v12, %v1661_v39 }
 0x2dc   : > { %v2812_v54 = vpop.eup %2811  ;;  %v2025_v24 = vadd.f32 1.0, %v2810_v40  ;;  %v1844_v28 = vsub.f32 0.0, %v1670_v38  ;;  %v1933_v37 = vmul.f32 1.442695, %v1843_v36 }
 0x2dd   : > { %v2814_v63 = vpop.eup %2813  ;;  %2831 = vrcp.f32 %v2027_v43  ;;  %v2028_v3 = vadd.f32 1.0, %v2812_v54  ;;  %v1842_v41 = vsub.f32 0.0, %v1662_v42  ;;  %v1929_v45 = vmul.f32 1.442695, %v1841_v44 }
 0x2de   : > { %v2816_v14 = vpop.eup %2815  ;;  %2833 = vrcp.f32 %v2025_v24  ;;  %v2026_v18 = vadd.f32 1.0, %v2814_v63  ;;  %v1935_v47 = vmul.f32 1.442695, %v1844_v28 }
 0x2df   : > { %v2818_v46 = vpop.eup %2817  ;;  %2216 = vst.msk [vmem:[%s3414_s10 + $0x70] sm:$0xff] %vm2201_vm2, %v2816_v14  ;;  %2835 = vrcp.f32 %v2028_v3  ;;  %v2689_v48 = vpop.f32.mrb[60].mxu0  ;;  %v1931_v51 = vmul.f32 1.442695, %v1842_v41 }
 0x2e0   : > { %v2820_v49 = vpop.eup %2819  ;;  %2214 = vst.msk [vmem:[%s3414_s10 + $0x60] sm:$0xff] %vm2201_vm2, %v2818_v46  ;;  %2837 = vrcp.f32 %v2026_v18  ;;  %v1683_v52 = vadd.f32 %v2689_v48, %v3392_v12  ;;  %v1674_v53 = vpop.f32.mrb[61].mxu0 }
 0x2e1   : > { %v2822_v55 = vpop.eup %2821  ;;  %2217 = vst.msk [vmem:[%s3414_s10 + $0x78] sm:$0xff] %vm2201_vm2, %v2820_v49  ;;  %2839 = vpow2.f32 %v1933_v37  ;;  %v1675_v56 = vadd.f32 %v3392_v12, %v1674_v53  ;;  %v2690_v57 = vpop.f32.mrb[62].mxu0 }
 0x2e2   : > { %v2824_v58 = vpop.eup %2823  ;;  %2215 = vst.msk [vmem:[%s3414_s10 + $0x68] sm:$0xff] %vm2201_vm2, %v2822_v55  ;;  %2841 = vpow2.f32 %v1929_v45  ;;  %v1847_v59 = vsub.f32 0.0, %v1683_v52  ;;  %v1686_v60 = vadd.f32 %v2690_v57, %v3392_v12  ;;  %v1677_v61 = vpop.f32.mrb[63].mxu0 }
 0x2e3   : > { %v2826_v62 = vpop.eup %2825  ;;  %v2031_v0 = vadd.f32 1.0, %v2824_v58  ;;  %2843 = vpow2.f32 %v1935_v47  ;;  %v1845_v1 = vsub.f32 0.0, %v1675_v56  ;;  %v1678_v2 = vadd.f32 %v3392_v12, %v1677_v61 }
 0x2e4   : > { %v2828_v4 = vpop.eup %2827  ;;  %v2029_v5 = vadd.f32 1.0, %v2826_v62  ;;  %2845 = vpow2.f32 %v1931_v51  ;;  %v1848_v6 = vsub.f32 0.0, %v1686_v60  ;;  %v1941_v9 = vmul.f32 1.442695, %v1847_v59 }
 0x2e5   : > { %v2830_v7 = vpop.eup %2829  ;;  %2847 = vrcp.f32 %v2031_v0  ;;  %v2032_v8 = vadd.f32 1.0, %v2828_v4  ;;  %v1846_v10 = vsub.f32 0.0, %v1678_v2  ;;  %v1937_v13 = vmul.f32 1.442695, %v1845_v1 }
 0x2e6   : > { %2849 = vrcp.f32 %v2029_v5  ;;  %v2030_v11 = vadd.f32 1.0, %v2830_v7  ;;  %v1943_v15 = vmul.f32 1.442695, %v1848_v6 }
 0x2e7   : > { %v2832_v50 = vpop.eup %2831  ;;  %2851 = vrcp.f32 %v2032_v8  ;;  %v2693_v16 = vpop.f32.mrb[64].mxu0  ;;  %v1939_v19 = vmul.f32 1.442695, %v1846_v10 }
 0x2e8   : > { %v2834_v17 = vpop.eup %2833  ;;  %2220 = vst.msk [vmem:[%s3414_s10 + $0x90] sm:$0xff] %vm2201_vm2, %v2832_v50  ;;  %2853 = vrcp.f32 %v2030_v11  ;;  %v1699_v20 = vadd.f32 %v2693_v16, %v3392_v12  ;;  %v1690_v21 = vpop.f32.mrb[65].mxu0 }
 0x2e9   : > { %v2836_v22 = vpop.eup %2835  ;;  %2218 = vst.msk [vmem:[%s3414_s10 + $0x80] sm:$0xff] %vm2201_vm2, %v2834_v17  ;;  %2855 = vpow2.f32 %v1941_v9  ;;  %v1691_v23 = vadd.f32 %v3392_v12, %v1690_v21  ;;  %v2694_v25 = vpop.f32.mrb[66].mxu0 }
 0x2ea   : > { %v2838_v26 = vpop.eup %2837  ;;  %2221 = vst.msk [vmem:[%s3414_s10 + $0x98] sm:$0xff] %vm2201_vm2, %v2836_v22  ;;  %2857 = vpow2.f32 %v1937_v13  ;;  %v1851_v27 = vsub.f32 0.0, %v1699_v20  ;;  %v1702_v29 = vadd.f32 %v2694_v25, %v3392_v12  ;;  %v1693_v30 = vpop.f32.mrb[67].mxu0 }
 0x2eb   : > { %v2840_v31 = vpop.eup %2839  ;;  %2219 = vst.msk [vmem:[%s3414_s10 + $0x88] sm:$0xff] %vm2201_vm2, %v2838_v26  ;;  %2859 = vpow2.f32 %v1943_v15  ;;  %v1849_v32 = vsub.f32 0.0, %v1691_v23  ;;  %v1694_v33 = vadd.f32 %v3392_v12, %v1693_v30 }
 0x2ec   : > { %v2842_v34 = vpop.eup %2841  ;;  %v2035_v35 = vadd.f32 1.0, %v2840_v31  ;;  %2861 = vpow2.f32 %v1939_v19  ;;  %v1852_v36 = vsub.f32 0.0, %v1702_v29  ;;  %v1949_v42 = vmul.f32 1.442695, %v1851_v27 }
 0x2ed   : > { %v2844_v38 = vpop.eup %2843  ;;  %v2033_v39 = vadd.f32 1.0, %v2842_v34  ;;  %v1850_v40 = vsub.f32 0.0, %v1694_v33  ;;  %v1945_v28 = vmul.f32 1.442695, %v1849_v32 }
 0x2ee   : > { %v2846_v43 = vpop.eup %2845  ;;  %2863 = vrcp.f32 %v2035_v35  ;;  %v2036_v44 = vadd.f32 1.0, %v2844_v38  ;;  %v1951_v37 = vmul.f32 1.442695, %v1852_v36 }
 0x2ef   : > { %v2848_v54 = vpop.eup %2847  ;;  %2865 = vrcp.f32 %v2033_v39  ;;  %v2034_v24 = vadd.f32 1.0, %v2846_v43  ;;  %v2697_v63 = vpop.f32.mrb[68].mxu0  ;;  %v1947_v45 = vmul.f32 1.442695, %v1850_v40 }
 0x2f0   : > { %v2850_v3 = vpop.eup %2849  ;;  %2224 = vst.msk [vmem:[%s3414_s10 + $0xb0] sm:$0xff] %vm2201_vm2, %v2848_v54  ;;  %2867 = vrcp.f32 %v2036_v44  ;;  %v1715_v41 = vadd.f32 %v2697_v63, %v3392_v12  ;;  %v1706_v14 = vpop.f32.mrb[69].mxu0 }
 0x2f1   : > { %v2852_v18 = vpop.eup %2851  ;;  %2222 = vst.msk [vmem:[%s3414_s10 + $0xa0] sm:$0xff] %vm2201_vm2, %v2850_v3  ;;  %2869 = vrcp.f32 %v2034_v24  ;;  %v1707_v46 = vadd.f32 %v3392_v12, %v1706_v14  ;;  %v2698_v47 = vpop.f32.mrb[70].mxu0 }
 0x2f2   : > { %v2854_v48 = vpop.eup %2853  ;;  %2225 = vst.msk [vmem:[%s3414_s10 + $0xb8] sm:$0xff] %vm2201_vm2, %v2852_v18  ;;  %2871 = vpow2.f32 %v1949_v42  ;;  %v1855_v49 = vsub.f32 0.0, %v1715_v41  ;;  %v1718_v51 = vadd.f32 %v2698_v47, %v3392_v12  ;;  %v1709_v52 = vpop.f32.mrb[71].mxu0 }
 0x2f3   : > { %v2856_v53 = vpop.eup %2855  ;;  %2223 = vst.msk [vmem:[%s3414_s10 + $0xa8] sm:$0xff] %vm2201_vm2, %v2854_v48  ;;  %2873 = vpow2.f32 %v1945_v28  ;;  %v1853_v55 = vsub.f32 0.0, %v1707_v46  ;;  %v1710_v56 = vadd.f32 %v3392_v12, %v1709_v52 }
 0x2f4   : > { %v2858_v57 = vpop.eup %2857  ;;  %v2039_v58 = vadd.f32 1.0, %v2856_v53  ;;  %2875 = vpow2.f32 %v1951_v37  ;;  %v1856_v59 = vsub.f32 0.0, %v1718_v51  ;;  %v1957_v2 = vmul.f32 1.442695, %v1855_v49 }
 0x2f5   : > { %v2860_v60 = vpop.eup %2859  ;;  %v2037_v61 = vadd.f32 1.0, %v2858_v57  ;;  %2877 = vpow2.f32 %v1947_v45  ;;  %v1854_v62 = vsub.f32 0.0, %v1710_v56  ;;  %v1953_v5 = vmul.f32 1.442695, %v1853_v55 }
 0x2f6   : > { %v2862_v0 = vpop.eup %2861  ;;  %2879 = vrcp.f32 %v2039_v58  ;;  %v2040_v1 = vadd.f32 1.0, %v2860_v60  ;;  %v1959_v8 = vmul.f32 1.442695, %v1856_v59 }
 0x2f7   : > { %2881 = vrcp.f32 %v2037_v61  ;;  %v2038_v4 = vadd.f32 1.0, %v2862_v0  ;;  %v2701_v6 = vpop.f32.mrb[72].mxu0  ;;  %v1955_v13 = vmul.f32 1.442695, %v1854_v62 }
 0x2f8   : > { %v2864_v7 = vpop.eup %2863  ;;  %2883 = vrcp.f32 %v2040_v1  ;;  %v1731_v9 = vadd.f32 %v2701_v6, %v3392_v12  ;;  %v1722_v10 = vpop.f32.mrb[73].mxu0 }
 0x2f9   : > { %v2866_v11 = vpop.eup %2865  ;;  %2228 = vst.msk [vmem:[%s3414_s10 + $0xd0] sm:$0xff] %vm2201_vm2, %v2864_v7  ;;  %2885 = vrcp.f32 %v2038_v4  ;;  %v1723_v50 = vadd.f32 %v3392_v12, %v1722_v10  ;;  %v2702_v15 = vpop.f32.mrb[74].mxu0 }
 0x2fa   : > { %v2868_v16 = vpop.eup %2867  ;;  %2226 = vst.msk [vmem:[%s3414_s10 + $0xc0] sm:$0xff] %vm2201_vm2, %v2866_v11  ;;  %2887 = vpow2.f32 %v1957_v2  ;;  %v1859_v17 = vsub.f32 0.0, %v1731_v9  ;;  %v1734_v19 = vadd.f32 %v2702_v15, %v3392_v12  ;;  %v1725_v20 = vpop.f32.mrb[75].mxu0 }
 0x2fb   : > { %v2870_v21 = vpop.eup %2869  ;;  %2229 = vst.msk [vmem:[%s3414_s10 + $0xd8] sm:$0xff] %vm2201_vm2, %v2868_v16  ;;  %2889 = vpow2.f32 %v1953_v5  ;;  %v1857_v22 = vsub.f32 0.0, %v1723_v50  ;;  %v1726_v23 = vadd.f32 %v3392_v12, %v1725_v20 }
 0x2fc   : > { %v2872_v25 = vpop.eup %2871  ;;  %2227 = vst.msk [vmem:[%s3414_s10 + $0xc8] sm:$0xff] %vm2201_vm2, %v2870_v21  ;;  %2891 = vpow2.f32 %v1959_v8  ;;  %v1965_v26 = vmul.f32 1.442695, %v1859_v17  ;;  %v1860_v27 = vsub.f32 0.0, %v1734_v19 }
 0x2fd   : > { %v2874_v29 = vpop.eup %2873  ;;  %v2043_v30 = vadd.f32 1.0, %v2872_v25  ;;  %2893 = vpow2.f32 %v1955_v13  ;;  %v1858_v31 = vsub.f32 0.0, %v1726_v23  ;;  %v1961_v36 = vmul.f32 1.442695, %v1857_v22 }
 0x2fe   : > { %v2876_v32 = vpop.eup %2875  ;;  %v2041_v33 = vadd.f32 1.0, %v2874_v29  ;;  %2895 = vpow2.f32 %v1965_v26  ;;  %v1967_v43 = vmul.f32 1.442695, %v1860_v27 }
 0x2ff   : > { %v2878_v34 = vpop.eup %2877  ;;  %2897 = vrcp.f32 %v2043_v30  ;;  %v2044_v35 = vadd.f32 1.0, %v2876_v32  ;;  %v2705_v38 = vpop.f32.mrb[76].mxu0  ;;  %v1963_v24 = vmul.f32 1.442695, %v1858_v31 }
 0x300   : > { %v2880_v39 = vpop.eup %2879  ;;  %2899 = vrcp.f32 %v2041_v33  ;;  %v2042_v40 = vadd.f32 1.0, %v2878_v34  ;;  %v1747_v44 = vadd.f32 %v2705_v38, %v3392_v12  ;;  %v1738_v42 = vpop.f32.mrb[77].mxu0 }
 0x301   : > { %v2882_v54 = vpop.eup %2881  ;;  %2232 = vst.msk [vmem:[%s3414_s10 + $0xf0] sm:$0xff] %vm2201_vm2, %v2880_v39  ;;  %2901 = vrcp.f32 %v2044_v35  ;;  %v1739_v28 = vadd.f32 %v3392_v12, %v1738_v42  ;;  %v2706_v63 = vpop.f32.mrb[78].mxu0 }
 0x302   : > { %v2884_v3 = vpop.eup %2883  ;;  %2230 = vst.msk [vmem:[%s3414_s10 + $0xe0] sm:$0xff] %vm2201_vm2, %v2882_v54  ;;  %2903 = vrcp.f32 %v2042_v40  ;;  %v1863_v37 = vsub.f32 0.0, %v1747_v44  ;;  %v1750_v41 = vadd.f32 %v2706_v63, %v3392_v12  ;;  %v1741_v14 = vpop.f32.mrb[79].mxu0 }
 0x303   : > { %v2886_v18 = vpop.eup %2885  ;;  %2233 = vst.msk [vmem:[%s3414_s10 + $0xf8] sm:$0xff] %vm2201_vm2, %v2884_v3  ;;  %2905 = vpow2.f32 %v1961_v36  ;;  %v1742_v45 = vadd.f32 %v3392_v12, %v1741_v14  ;;  %v1861_v48 = vsub.f32 0.0, %v1739_v28 }
 0x304   : > { %v2888_v46 = vpop.eup %2887  ;;  %2231 = vst.msk [vmem:[%s3414_s10 + $0xe8] sm:$0xff] %vm2201_vm2, %v2886_v18  ;;  %2907 = vpow2.f32 %v1967_v43  ;;  %v1973_v47 = vmul.f32 1.442695, %v1863_v37  ;;  %v1864_v52 = vsub.f32 0.0, %v1750_v41 }
 0x305   : > { %v2890_v49 = vpop.eup %2889  ;;  %v2047_v51 = vadd.f32 1.0, %v2888_v46  ;;  %2909 = vpow2.f32 %v1963_v24  ;;  %v1862_v56 = vsub.f32 0.0, %v1742_v45  ;;  %v1969_v62 = vmul.f32 1.442695, %v1861_v48 }
 0x306   : > { %v2892_v53 = vpop.eup %2891  ;;  %v2045_v55 = vadd.f32 1.0, %v2890_v49  ;;  %2911 = vpow2.f32 %v1973_v47  ;;  %v1975_v5 = vmul.f32 1.442695, %v1864_v52 }
 0x307   : > { %v2894_v57 = vpop.eup %2893  ;;  %2913 = vrcp.f32 %v2047_v51  ;;  %v2048_v58 = vadd.f32 1.0, %v2892_v53  ;;  %v2709_v59 = vpop.f32.mrb[80].mxu0  ;;  %v1971_v9 = vmul.f32 1.442695, %v1862_v56 }
 0x308   : > { %v2896_v60 = vpop.eup %2895  ;;  %2915 = vrcp.f32 %v2045_v55  ;;  %v2046_v61 = vadd.f32 1.0, %v2894_v57  ;;  %v1763_v0 = vadd.f32 %v2709_v59, %v3392_v12  ;;  %v1754_v1 = vpop.f32.mrb[81].mxu0 }
 0x309   : > { %v2898_v2 = vpop.eup %2897  ;;  %2917 = vrcp.f32 %v2048_v58  ;;  %v2051_v4 = vadd.f32 1.0, %v2896_v60  ;;  %v1755_v6 = vadd.f32 %v3392_v12, %v1754_v1  ;;  %v2710_v7 = vpop.f32.mrb[82].mxu0 }
 0x30a   : > { %v2900_v8 = vpop.eup %2899  ;;  %2236 = vst.msk [vmem:[%s3414_s10 + $0x110] sm:$0xff] %vm2201_vm2, %v2898_v2  ;;  %2919 = vrcp.f32 %v2046_v61  ;;  %v1867_v10 = vsub.f32 0.0, %v1763_v0  ;;  %v1766_v11 = vadd.f32 %v2710_v7, %v3392_v12  ;;  %v1757_v13 = vpop.f32.mrb[83].mxu0 }
 0x30b   : > { %v2902_v50 = vpop.eup %2901  ;;  %2234 = vst.msk [vmem:[%s3414_s10 + $0x100] sm:$0xff] %vm2201_vm2, %v2900_v8  ;;  %2921 = vrcp.f32 %v2051_v4  ;;  %v1758_v15 = vadd.f32 %v3392_v12, %v1757_v13  ;;  %v1865_v19 = vsub.f32 0.0, %v1755_v6  ;;  %v3007_v4 = vld [vmem:[%s3599_s6] ss:$0 sm:$0xff] }
 0x30c   : > { %v2904_v16 = vpop.eup %2903  ;;  %2237 = vst.msk [vmem:[%s3414_s10 + $0x118] sm:$0xff] %vm2201_vm2, %v2902_v50  ;;  %2923 = vpow2.f32 %v1969_v62  ;;  %v1981_v17 = vmul.f32 1.442695, %v1867_v10  ;;  %v1868_v21 = vsub.f32 0.0, %v1766_v11 }
 0x30d   : > { %v2906_v20 = vpop.eup %2905  ;;  %2235 = vst.msk [vmem:[%s3414_s10 + $0x108] sm:$0xff] %vm2201_vm2, %v2904_v16  ;;  %2925 = vpow2.f32 %v1975_v5  ;;  %v1866_v25 = vsub.f32 0.0, %v1758_v15  ;;  %v1977_v32 = vmul.f32 1.442695, %v1865_v19 }
 0x30e   : > { %v2908_v22 = vpop.eup %2907  ;;  %v2049_v23 = vadd.f32 1.0, %v2906_v20  ;;  %2927 = vpow2.f32 %v1971_v9  ;;  %v1983_v38 = vmul.f32 1.442695, %v1868_v21 }
 0x30f   : > { %v2910_v26 = vpop.eup %2909  ;;  %v2052_v27 = vadd.f32 1.0, %v2908_v22  ;;  %2929 = vpow2.f32 %v1981_v17  ;;  %v2713_v29 = vpop.f32.mrb[84].mxu0  ;;  %v1979_v44 = vmul.f32 1.442695, %v1866_v25 }
 0x310   : > { %v2912_v30 = vpop.eup %2911  ;;  %2931 = vrcp.f32 %v2049_v23  ;;  %v2050_v31 = vadd.f32 1.0, %v2910_v26  ;;  %v1779_v33 = vadd.f32 %v2713_v29, %v3392_v12  ;;  %v1770_v34 = vpop.f32.mrb[85].mxu0 }
 0x311   : > { %v2914_v35 = vpop.eup %2913  ;;  %2933 = vrcp.f32 %v2052_v27  ;;  %v2055_v36 = vadd.f32 1.0, %v2912_v30  ;;  %v1771_v39 = vadd.f32 %v3392_v12, %v1770_v34  ;;  %v2714_v40 = vpop.f32.mrb[86].mxu0 }
 0x312   : > { %v2916_v43 = vpop.eup %2915  ;;  %2240 = vst.msk [vmem:[%s3414_s10 + $0x130] sm:$0xff] %vm2201_vm2, %v2914_v35  ;;  %2935 = vrcp.f32 %v2050_v31  ;;  %v1871_v42 = vsub.f32 0.0, %v1779_v33  ;;  %v1782_v54 = vadd.f32 %v2714_v40, %v3392_v12  ;;  %v1773_v24 = vpop.f32.mrb[87].mxu0 }
 0x313   : > { %v2918_v28 = vpop.eup %2917  ;;  %2238 = vst.msk [vmem:[%s3414_s10 + $0x120] sm:$0xff] %vm2201_vm2, %v2916_v43  ;;  %2937 = vrcp.f32 %v2055_v36  ;;  %v1869_v63 = vsub.f32 0.0, %v1771_v39  ;;  %v1774_v3 = vadd.f32 %v3392_v12, %v1773_v24 }
 0x314   : > { %v2920_v37 = vpop.eup %2919  ;;  %2241 = vst.msk [vmem:[%s3414_s10 + $0x138] sm:$0xff] %vm2201_vm2, %v2918_v28  ;;  %2939 = vpow2.f32 %v1977_v32  ;;  %v1989_v41 = vmul.f32 1.442695, %v1871_v42  ;;  %v1872_v14 = vsub.f32 0.0, %v1782_v54 }
 0x315   : > { %v2922_v18 = vpop.eup %2921  ;;  %2239 = vst.msk [vmem:[%s3414_s10 + $0x128] sm:$0xff] %vm2201_vm2, %v2920_v37  ;;  %2941 = vpow2.f32 %v1983_v38  ;;  %v1985_v45 = vmul.f32 1.442695, %v1869_v63  ;;  %v1870_v46 = vsub.f32 0.0, %v1774_v3 }
 0x316   : > { %v2924_v47 = vpop.eup %2923  ;;  %2244 = vst.msk [vmem:[%s3414_s10 + $0x150] sm:$0xff] %vm2201_vm2, %v2922_v18  ;;  %2943 = vpow2.f32 %v1979_v44  ;;  %v1991_v55 = vmul.f32 1.442695, %v1872_v14 }
 0x317   : > { %v2926_v48 = vpop.eup %2925  ;;  %v2053_v49 = vadd.f32 1.0, %v2924_v47  ;;  %2945 = vpow2.f32 %v1989_v41  ;;  %v2717_v51 = vpop.f32.mrb[88].mxu0  ;;  %v1987_v60 = vmul.f32 1.442695, %v1870_v46 }
 0x318   : > { %v2928_v52 = vpop.eup %2927  ;;  %v2056_v53 = vadd.f32 1.0, %v2926_v48  ;;  %2947 = vpow2.f32 %v1985_v45  ;;  %v1795_v56 = vadd.f32 %v2717_v51, %v3392_v12  ;;  %v1786_v57 = vpop.f32.mrb[89].mxu0 }
 0x319   : > { %v2930_v58 = vpop.eup %2929  ;;  %2949 = vrcp.f32 %v2053_v49  ;;  %v2054_v59 = vadd.f32 1.0, %v2928_v52  ;;  %v1787_v61 = vadd.f32 %v3392_v12, %v1786_v57  ;;  %v2718_v62 = vpop.f32.mrb[90].mxu0 }
 0x31a   : > { %v2932_v0 = vpop.eup %2931  ;;  %2951 = vrcp.f32 %v2056_v53  ;;  %v2059_v1 = vadd.f32 1.0, %v2930_v58  ;;  %v1875_v2 = vsub.f32 0.0, %v1795_v56  ;;  %v1798_v5 = vadd.f32 %v3007_v4, %v2718_v62  ;;  %v1789_v6 = vpop.f32.mrb[91].mxu0 }
 0x31b   : > { %v2934_v7 = vpop.eup %2933  ;;  %2242 = vst.msk [vmem:[%s3414_s10 + $0x140] sm:$0xff] %vm2201_vm2, %v2932_v0  ;;  %2953 = vrcp.f32 %v2054_v59  ;;  %v1873_v8 = vsub.f32 0.0, %v1787_v61  ;;  %v1790_v9 = vadd.f32 %v3007_v4, %v1789_v6 }
 0x31c   : > { %v2936_v12 = vpop.eup %2935  ;;  %2245 = vst.msk [vmem:[%s3414_s10 + $0x158] sm:$0xff] %vm2201_vm2, %v2934_v7  ;;  %2955 = vrcp.f32 %v2059_v1  ;;  %v1997_v10 = vmul.f32 1.442695, %v1875_v2  ;;  %v1876_v11 = vsub.f32 0.0, %v1798_v5 }
 0x31d   : > { %v2938_v13 = vpop.eup %2937  ;;  %2243 = vst.msk [vmem:[%s3414_s10 + $0x148] sm:$0xff] %vm2201_vm2, %v2936_v12  ;;  %2957 = vpow2.f32 %v1991_v55  ;;  %v1993_v50 = vmul.f32 1.442695, %v1873_v8  ;;  %v1874_v15 = vsub.f32 0.0, %v1790_v9 }
 0x31e   : > { %v2940_v16 = vpop.eup %2939  ;;  %2248 = vst.msk [vmem:[%s3414_s10 + $0x170] sm:$0xff] %vm2201_vm2, %v2938_v13  ;;  %2959 = vpow2.f32 %v1987_v60  ;;  %v1999_v23 = vmul.f32 1.442695, %v1876_v11 }
 0x31f   : > { %v2942_v17 = vpop.eup %2941  ;;  %v2057_v19 = vadd.f32 1.0, %v2940_v16  ;;  %2961 = vpow2.f32 %v1997_v10  ;;  %v2721_v20 = vpop.f32.mrb[92].mxu0  ;;  %v1995_v30 = vmul.f32 1.442695, %v1874_v15 }
 0x320   : > { %v2944_v21 = vpop.eup %2943  ;;  %v2060_v22 = vadd.f32 1.0, %v2942_v17  ;;  %2963 = vpow2.f32 %v1993_v50  ;;  %v1811_v25 = vadd.f32 %v3007_v4, %v2721_v20  ;;  %v1802_v26 = vpop.f32.mrb[93].mxu0 }
 0x321   : > { %v2946_v27 = vpop.eup %2945  ;;  %2965 = vrcp.f32 %v2057_v19  ;;  %v2058_v29 = vadd.f32 1.0, %v2944_v21  ;;  %v1803_v31 = vadd.f32 %v3007_v4, %v1802_v26  ;;  %v2722_v32 = vpop.f32.mrb[94].mxu0 }
 0x322   : > { %v2948_v33 = vpop.eup %2947  ;;  %2967 = vrcp.f32 %v2060_v22  ;;  %v2063_v34 = vadd.f32 1.0, %v2946_v27  ;;  %v1879_v35 = vsub.f32 0.0, %v1811_v25  ;;  %v1814_v36 = vadd.f32 %v3007_v4, %v2722_v32  ;;  %v1805_v38 = vpop.f32.mrb[95].mxu0 }
 0x323   : > { %v2950_v39 = vpop.eup %2949  ;;  %2969 = vrcp.f32 %v2058_v29  ;;  %v2061_v40 = vadd.f32 1.0, %v2948_v33  ;;  %v1877_v43 = vsub.f32 0.0, %v1803_v31  ;;  %v1806_v44 = vadd.f32 %v3007_v4, %v1805_v38 }
 0x324   : > { %v2952_v42 = vpop.eup %2951  ;;  %2246 = vst.msk [vmem:[%s3414_s10 + $0x160] sm:$0xff] %vm2201_vm2, %v2950_v39  ;;  %2971 = vrcp.f32 %v2063_v34  ;;  %v2005_v54 = vmul.f32 1.442695, %v1879_v35  ;;  %v1880_v3 = vsub.f32 0.0, %v1814_v36 }
 0x325   : > { %v2954_v24 = vpop.eup %2953  ;;  %2249 = vst.msk [vmem:[%s3414_s10 + $0x178] sm:$0xff] %vm2201_vm2, %v2952_v42  ;;  %2973 = vrcp.f32 %v2061_v40  ;;  %v2001_v28 = vmul.f32 1.442695, %v1877_v43  ;;  %v1878_v41 = vsub.f32 0.0, %v1806_v44 }
 0x326   : > { %v2956_v63 = vpop.eup %2955  ;;  %2247 = vst.msk [vmem:[%s3414_s10 + $0x168] sm:$0xff] %vm2201_vm2, %v2954_v24  ;;  %2975 = vpow2.f32 %v1999_v23  ;;  %v2007_v49 = vmul.f32 1.442695, %v1880_v3 }
 0x327   : > { %v2958_v37 = vpop.eup %2957  ;;  %2252 = vst.msk [vmem:[%s3414_s10 + $0x190] sm:$0xff] %vm2201_vm2, %v2956_v63  ;;  %2977 = vpow2.f32 %v1995_v30  ;;  %v2003_v53 = vmul.f32 1.442695, %v1878_v41 }
 0x328   : > { %v2960_v14 = vpop.eup %2959  ;;  %v2064_v18 = vadd.f32 1.0, %v2958_v37  ;;  %2979 = vpow2.f32 %v2005_v54 }
 0x329   : > { %v2962_v45 = vpop.eup %2961  ;;  %v2062_v46 = vadd.f32 1.0, %v2960_v14  ;;  %2981 = vpow2.f32 %v2001_v28 }
 0x32a   : > { %v2964_v47 = vpop.eup %2963  ;;  %2983 = vrcp.f32 %v2064_v18  ;;  %v2067_v48 = vadd.f32 1.0, %v2962_v45 }
 0x32b   : > { %v2966_v51 = vpop.eup %2965  ;;  %2985 = vrcp.f32 %v2062_v46  ;;  %v2065_v52 = vadd.f32 1.0, %v2964_v47 }
 0x32c   : > { %v2968_v55 = vpop.eup %2967  ;;  %2250 = vst.msk [vmem:[%s3414_s10 + $0x180] sm:$0xff] %vm2201_vm2, %v2966_v51  ;;  %2987 = vrcp.f32 %v2067_v48 }
 0x32d   : > { %v2970_v56 = vpop.eup %2969  ;;  %2253 = vst.msk [vmem:[%s3414_s10 + $0x198] sm:$0xff] %vm2201_vm2, %v2968_v55  ;;  %2989 = vrcp.f32 %v2065_v52 }
 0x32e   : > { %v2972_v57 = vpop.eup %2971  ;;  %2251 = vst.msk [vmem:[%s3414_s10 + $0x188] sm:$0xff] %vm2201_vm2, %v2970_v56  ;;  %2991 = vpow2.f32 %v2007_v49 }
 0x32f   : > { %v2974_v58 = vpop.eup %2973  ;;  %2256 = vst.msk [vmem:[%s3414_s10 + $0x1b0] sm:$0xff] %vm2201_vm2, %v2972_v57  ;;  %2993 = vpow2.f32 %v2003_v53 }
 0x330   : > { %v2976_v59 = vpop.eup %2975  ;;  %2254 = vst.msk [vmem:[%s3414_s10 + $0x1a0] sm:$0xff] %vm2201_vm2, %v2974_v58 }
 0x331   : > { %v2978_v60 = vpop.eup %2977  ;;  %v2068_v61 = vadd.f32 1.0, %v2976_v59 }
 0x332   : > { %v2980_v62 = vpop.eup %2979  ;;  %v2066_v0 = vadd.f32 1.0, %v2978_v60 }
 0x333   : > { %v2982_v1 = vpop.eup %2981  ;;  %2995 = vrcp.f32 %v2068_v61  ;;  %v2071_v2 = vadd.f32 1.0, %v2980_v62 }
 0x334   : > { %v2984_v4 = vpop.eup %2983  ;;  %2997 = vrcp.f32 %v2066_v0  ;;  %v2069_v5 = vadd.f32 1.0, %v2982_v1 }
 0x335   : > { %v2986_v6 = vpop.eup %2985  ;;  %2257 = vst.msk [vmem:[%s3414_s10 + $0x1b8] sm:$0xff] %vm2201_vm2, %v2984_v4  ;;  %2999 = vrcp.f32 %v2071_v2 }
 0x336   : > { %v2988_v7 = vpop.eup %2987  ;;  %2255 = vst.msk [vmem:[%s3414_s10 + $0x1a8] sm:$0xff] %vm2201_vm2, %v2986_v6  ;;  %3001 = vrcp.f32 %v2069_v5 }
 0x337   : > { %v2990_v8 = vpop.eup %2989  ;;  %2260 = vst.msk [vmem:[%s3414_s10 + $0x1d0] sm:$0xff] %vm2201_vm2, %v2988_v7 }
 0x338   : > { %v2992_v9 = vpop.eup %2991  ;;  %2258 = vst.msk [vmem:[%s3414_s10 + $0x1c0] sm:$0xff] %vm2201_vm2, %v2990_v8 }
 0x339   : > { %v2994_v12 = vpop.eup %2993  ;;  %v2072_v10 = vadd.f32 1.0, %v2992_v9 }
 0x33a   : > { %v2070_v11 = vadd.f32 1.0, %v2994_v12 }
 0x33b   : > { %3003 = vrcp.f32 %v2072_v10 }
 0x33c   : > { %3005 = vrcp.f32 %v2070_v11 }
 0x33d   : > { %v2996_v13 = vpop.eup %2995 }
 0x33e   : > { %v2998_v50 = vpop.eup %2997  ;;  %2261 = vst.msk [vmem:[%s3414_s10 + $0x1d8] sm:$0xff] %vm2201_vm2, %v2996_v13 }
 0x33f   : > { %v3000_v15 = vpop.eup %2999  ;;  %2259 = vst.msk [vmem:[%s3414_s10 + $0x1c8] sm:$0xff] %vm2201_vm2, %v2998_v50 }
 0x340   : > { %v3002_v16 = vpop.eup %3001  ;;  %2264 = vst.msk [vmem:[%s3414_s10 + $0x1f0] sm:$0xff] %vm2201_vm2, %v3000_v15 }
 0x341   : > { %2262 = vst.msk [vmem:[%s3414_s10 + $0x1e0] sm:$0xff] %vm2201_vm2, %v3002_v16 }
 0x345   : > { %v3004_v17 = vpop.eup %3003 }
 0x346   : > { %v3006_v19 = vpop.eup %3005  ;;  %2265 = vst.msk [vmem:[%s3414_s10 + $0x1f8] sm:$0xff] %vm2201_vm2, %v3004_v17 }
 0x347   : > { %2263 = vst.msk [vmem:[%s3414_s10 + $0x1e8] sm:$0xff] %vm2201_vm2, %v3006_v19 }
 0x348 PF: > { %s17_s24 = sadd.s32 1, %s3014_s24  }
 0x349   : > { %p14_p4 = scmp.ge.s32.totalorder %s17_s24, 4  }
 0x34b   :  { %16 = sbr.rel (!%p14_p4) target bundleno = 1 (0x1), region = 78 }

</bundles_post_ra>
